<compile_context>
chip_gen: v7x
topology: tpu7x:2x2x1
jax: 0.10.0
libtpu: 0.0.40
codegen_flags: <defaults>
</compile_context>

<pallas_src>
import functools

import jax
import jax.numpy as jnp
import numpy as np
from jax.experimental import pallas as pl
from jax.experimental.pallas import tpu as pltpu


def gat_row_tile_kernel(mask_ref, wh_ref, s1_ref, s2_ref, hp_ref, alpha_ref, *,
                        num_rows, tail_mask):
    """One row tile; heads processed by a static in-kernel loop.

    mask_ref : (TM, N)            int8   adjacency (1 on edges), row tile
    wh_ref   : (heads, N, Cout)   f32    per-head projected features (grid-invariant)
    s1_ref   : (heads, TM, 1)     f32    Wh @ a1, row tile
    s2_ref   : (heads, 1, N)      f32    (Wh @ a2)^T, lane-dense (grid-invariant)
    hp_ref   : (TM, heads*Cout)   f32    relu'd concatenated head outputs
    alpha_ref: (TM, N)            f32    mean attention over heads
    """
    heads, _, cout = wh_ref.shape
    tm, n = alpha_ref.shape

    # 2-D edge predicate shared by every head (no (heads, TM, N) broadcast slab).
    edge = mask_ref[...] != 0
    if tail_mask:
        # cdiv grid: zero out the padded tail rows so stale VMEM can't produce NaNs
        # (their outputs are discarded on writeback anyway).
        row_ids = pl.program_id(0) * tm + jax.lax.broadcasted_iota(
            jnp.int32, (tm, n), 0)
        edge = jnp.logical_and(edge, row_ids < num_rows)

    alpha_acc = jnp.zeros((tm, n), jnp.float32)

    # Static unroll over heads: only one (TM, N) elementwise chain is live at a time,
    # so peak VMEM is ~heads x smaller than the fully batched formulation.
    for hd in range(heads):
        # e_ij = leakyrelu(a1 . Wh[i] + a2 . Wh[j]) on the dense (TM, N) slab.
        scores = s1_ref[hd] + s2_ref[hd]                            # (TM,1)+(1,N)->(TM,N)
        scores = jnp.where(scores >= 0.0, scores, 0.2 * scores)     # LeakyReLU(0.2)

        # scatter onto the dense matrix: non-edges are exactly 0 before softmax
        z = jnp.where(edge, scores, 0.0)                            # (TM, N)

        # dense row softmax (zeros participate, matching torch semantics)
        m = jnp.max(z, axis=-1, keepdims=True)
        ez = jnp.exp(z - m)
        denom = jnp.sum(ez, axis=-1, keepdims=True)
        attn = ez * pl.reciprocal(denom, approx=False)              # (TM, N)

        # incremental mean-over-heads accumulator (no (heads,TM,N) slab, no NxN acc)
        alpha_acc = alpha_acc + attn

        # h'_head = attn @ Wh_head (MXU), ReLU, static lane-slice store (no concat)
        hp = jnp.dot(attn, wh_ref[hd], preferred_element_type=jnp.float32)  # (TM, Cout)
        hp_ref[:, hd * cout:(hd + 1) * cout] = jnp.maximum(hp, 0.0)

    alpha_ref[...] = alpha_acc * (1.0 / float(heads))   # exact for power-of-2 heads


def _round_up(x, m):
    return ((x + m - 1) // m) * m


def _vmem_limit_bytes():
    """~0.65x of physical per-core VMEM: ~40 MiB on v7x (64 MiB), ~83 MiB on v5e/v6e."""
    cap = 64 * 1024 * 1024  # conservative default = v7x per-TC physical VMEM
    try:
        info = pltpu.get_tpu_info()
        cap = int(getattr(info, "vmem_capacity_bytes", cap))
    except Exception:
        pass
    cap = max(cap, 32 * 1024 * 1024)
    return int(cap * 0.65)


def _pick_row_tile(n, heads, cout, vmem_budget_bytes):
    """Row-tile height TM derived from the VMEM budget (head loop already assumed).

    Per-step VMEM:
      fixed (grid-invariant, ideally single-buffered):
          Wh: heads*N*Cout*4   +   s2 (sublane-padded): heads*8*N*4
      per row of the tile:
          int8 mask (double-buffered)                   : 2 * N
          f32 alpha output (double-buffered)            : 8 * N
          ~4 live f32 (TM, N) slabs in the head loop    : 16 * N
          f32 h' output (double-buffered) + s1          : 8*heads*cout + 16
    """
    if n <= 32:
        return n
    fixed = heads * n * cout * 4 + heads * 8 * n * 4
    per_row = 2 * n + 8 * n + 16 * n + 8 * heads * cout + 16
    tm = max(vmem_budget_bytes - fixed, per_row) // per_row
    tm = max((tm // 32) * 32, 32)          # multiple of 32: int8 sublane tile safe
    if n >= 64:
        # keep at least two row tiles so the "parallel" axis feeds both v7x TensorCores
        tm = min(tm, _round_up(-(-n // 2), 32))
    return n if tm >= n else tm


def multi_head_gat(h, edge_index, W, a):
    """h: (N, Cin) f32, edge_index: (2, E) i32,
       W: (heads, Cout, Cin) (torch Linear weight layout), a: (heads, 2*Cout, 1)."""
    N, Cin = h.shape
    heads, Cout, _ = W.shape

    # --- hoisted projections (batched XLA matmuls; the kernel keeps the N^2 work) ---
    Wh = jnp.einsum('nc,hoc->hno', h, W)                       # (heads, N, Cout)
    a1 = a[:, :Cout, 0]                                        # (heads, Cout)
    a2 = a[:, Cout:, 0]                                        # (heads, Cout)
    s1 = jnp.einsum('hno,ho->hn', Wh, a1)[:, :, None]          # (heads, N, 1)
    s2 = jnp.einsum('hno,ho->hn', Wh, a2)[:, None, :]          # (heads, 1, N) lane-dense

    # dense int8 adjacency mask from edge_index (duplicates collapse to 1, as in torch)
    row, col = edge_index[0], edge_index[1]
    mask = jnp.zeros((N, N), jnp.int8).at[row, col].set(1)

    vmem_limit = _vmem_limit_bytes()
    TM = _pick_row_tile(N, heads, Cout, int(vmem_limit * 0.8))
    grid = (pl.cdiv(N, TM),)
    tail = (N % TM) != 0

    kernel = functools.partial(gat_row_tile_kernel, num_rows=N, tail_mask=tail)

    def build(single_buffer_invariants):
        inv = dict(pipeline_mode=pl.Buffered(1)) if single_buffer_invariants else {}
        return pl.pallas_call(
            kernel,
            out_shape=(
                jax.ShapeDtypeStruct((N, heads * Cout), jnp.float32),
                jax.ShapeDtypeStruct((N, N), jnp.float32),
            ),
            grid_spec=pltpu.PrefetchScalarGridSpec(
                num_scalar_prefetch=0,
                grid=grid,
                in_specs=[
                    pl.BlockSpec((TM, N), lambda i: (i, 0)),                # int8 mask, row tile
                    pl.BlockSpec((heads, N, Cout), lambda i: (0, 0, 0), **inv),  # Wh (invariant)
                    pl.BlockSpec((heads, TM, 1), lambda i: (0, i, 0)),      # s1, row tile
                    pl.BlockSpec((heads, 1, N), lambda i: (0, 0, 0), **inv),     # s2 (invariant)
                ],
                out_specs=[
                    pl.BlockSpec((TM, heads * Cout), lambda i: (i, 0)),     # h' lane-dense slab
                    pl.BlockSpec((TM, N), lambda i: (i, 0)),                # mean attention rows
                ],
            ),
            compiler_params=pltpu.CompilerParams(
                dimension_semantics=("parallel",),   # row tiles shard across TCs (v7x)
                vmem_limit_bytes=vmem_limit,
            ),
        )

    try:
        return build(True)(mask, Wh, s1, s2)
    except Exception:
        # Fall back to default double buffering if Buffered(1) is rejected by this build.
        return build(False)(mask, Wh, s1, s2)


def reference(h, edge_index, W, a):
    """Pure-JAX reference mirroring the PyTorch module."""
    N = h.shape[0]
    heads = W.shape[0]
    outs, attns = [], []
    row, col = edge_index[0], edge_index[1]
    for hd in range(heads):
        Wh = h @ W[hd].T
        a_in = jnp.concatenate([Wh[row], Wh[col]], axis=1)
        e = (a_in @ a[hd]).squeeze(-1)
        e = jnp.where(e >= 0, e, 0.2 * e)
        alpha = jnp.zeros((N, N), jnp.float32).at[row, col].set(e)
        alpha = jax.nn.softmax(alpha, axis=1)
        outs.append(alpha @ Wh)
        attns.append(alpha)
    return jax.nn.relu(jnp.concatenate(outs, axis=1)), jnp.mean(jnp.stack(attns), axis=0)


if __name__ == "__main__":
    N, Cin, Cout, heads = 16, 8, 8, 4

    key = jax.random.PRNGKey(0)
    k_h, k_w, k_a = jax.random.split(key, 3)

    h = jax.random.normal(k_h, (N, Cin), jnp.float32)

    # deterministic param init (shapes match the torch module; values synthetic)
    W = jax.random.normal(k_w, (heads, Cout, Cin), jnp.float32) * (1.0 / np.sqrt(Cin))
    lim = float(np.sqrt(6.0 / (2 * Cout + 1)) * 1.414)  # xavier_uniform gain=1.414
    a = jax.random.uniform(k_a, (heads, 2 * Cout, 1), jnp.float32, -lim, lim)

    # synthetic deterministic edge set (ring + skip connections), shape (2, E)
    src = np.arange(N, dtype=np.int32)
    ring = np.stack([src, (src + 1) % N])
    skip = np.stack([src, (src + 3) % N])
    edge_index = jnp.asarray(np.concatenate([ring, skip], axis=1), jnp.int32)

    out, attn = multi_head_gat(h, edge_index, W, a)
    jax.block_until_ready((out, attn))

    ref_out, ref_attn = reference(h, edge_index, W, a)
    assert out.shape == (N, heads * Cout) and attn.shape == (N, N)
    np.testing.assert_allclose(np.asarray(out), np.asarray(ref_out), rtol=1e-5, atol=1e-5)
    np.testing.assert_allclose(np.asarray(attn), np.asarray(ref_attn), rtol=1e-5, atol=1e-5)

    print("KERNEL_OK")
</pallas_src>

<mosaic_0001>
module attributes {stable_mosaic.version = 11 : i64} {
  func.func @gat_row_tile_kernel(%arg0: i32, %arg1: memref<16x16xi8, #tpu.memory_space<vmem>>, %arg2: memref<4x16x8xf32, #tpu.memory_space<vmem>>, %arg3: memref<4x16x1xf32, #tpu.memory_space<vmem>>, %arg4: memref<4x1x16xf32, #tpu.memory_space<vmem>>, %arg5: memref<16x32xf32, #tpu.memory_space<vmem>>, %arg6: memref<16x16xf32, #tpu.memory_space<vmem>>) attributes {dimension_semantics = [#tpu.dimension_semantics<parallel>], iteration_bounds = array<i64: 1>, scalar_prefetch = 0 : i64, scratch_operands = 0 : i64, tpu.core_type = #tpu.core_type<tc>, window_params = [{transform_indices = @transform_0, window_bounds = array<i64: 16, 16>}, {pipeline_mode = #tpu.pipeline_mode<synchronous>, transform_indices = @transform_1, window_bounds = array<i64: 4, 16, 8>}, {transform_indices = @transform_2, window_bounds = array<i64: 4, 16, 1>}, {pipeline_mode = #tpu.pipeline_mode<synchronous>, transform_indices = @transform_3, window_bounds = array<i64: 4, 1, 16>}, {transform_indices = @transform_4, window_bounds = array<i64: 16, 32>}, {transform_indices = @transform_5, window_bounds = array<i64: 16, 16>}]} {
    %c0 = arith.constant 0 : index
    %c0_0 = arith.constant 0 : index
    %0 = vector.load %arg1[%c0, %c0_0] : memref<16x16xi8, #tpu.memory_space<vmem>>, vector<16x16xi8>
    %c0_i8 = arith.constant 0 : i8
    %1 = vector.broadcast %c0_i8 : i8 to vector<16x16xi8>
    %2 = arith.cmpi ne, %0, %1 : vector<16x16xi8>
    %cst = arith.constant 0.000000e+00 : f32
    %3 = vector.broadcast %cst : f32 to vector<16x16xf32>
    %c0_1 = arith.constant 0 : index
    %c0_2 = arith.constant 0 : index
    %c0_3 = arith.constant 0 : index
    %4 = vector.load %arg3[%c0_1, %c0_2, %c0_3] : memref<4x16x1xf32, #tpu.memory_space<vmem>>, vector<1x16x1xf32>
    %5 = vector.shape_cast %4 : vector<1x16x1xf32> to vector<16x1xf32>
    %c0_4 = arith.constant 0 : index
    %c0_5 = arith.constant 0 : index
    %c0_6 = arith.constant 0 : index
    %6 = vector.load %arg4[%c0_4, %c0_5, %c0_6] : memref<4x1x16xf32, #tpu.memory_space<vmem>>, vector<1x1x16xf32>
    %7 = vector.shape_cast %6 : vector<1x1x16xf32> to vector<1x16xf32>
    %8 = vector.broadcast %5 : vector<16x1xf32> to vector<16x16xf32>
    %9 = vector.broadcast %7 : vector<1x16xf32> to vector<16x16xf32>
    %10 = arith.addf %8, %9 : vector<16x16xf32>
    %cst_7 = arith.constant 0.000000e+00 : f32
    %11 = vector.broadcast %cst_7 : f32 to vector<16x16xf32>
    %12 = arith.cmpf oge, %10, %11 : vector<16x16xf32>
    %cst_8 = arith.constant 2.000000e-01 : f32
    %13 = vector.broadcast %cst_8 : f32 to vector<16x16xf32>
    %14 = arith.mulf %13, %10 : vector<16x16xf32>
    %15 = arith.select %12, %10, %14 : vector<16x16xi1>, vector<16x16xf32>
    %cst_9 = arith.constant 0.000000e+00 : f32
    %16 = vector.broadcast %cst_9 : f32 to vector<16x16xf32>
    %17 = arith.select %2, %15, %16 : vector<16x16xi1>, vector<16x16xf32>
    %cst_10 = arith.constant dense<0xFF800000> : vector<16xf32>
    %18 = vector.multi_reduction <maximumf>, %17, %cst_10 [1] : vector<16x16xf32> to vector<16xf32>
    %19 = vector.shape_cast %18 : vector<16xf32> to vector<16x1xf32>
    %20 = vector.broadcast %19 : vector<16x1xf32> to vector<16x16xf32>
    %21 = arith.subf %17, %20 : vector<16x16xf32>
    %22 = math.exp %21 : vector<16x16xf32>
    %cst_11 = arith.constant dense<0.000000e+00> : vector<16xf32>
    %23 = vector.multi_reduction <add>, %22, %cst_11 [1] : vector<16x16xf32> to vector<16xf32>
    %24 = vector.shape_cast %23 : vector<16xf32> to vector<16x1xf32>
    %25 = tpu.reciprocal %24 : vector<16x1xf32> -> vector<16x1xf32>
    %26 = vector.broadcast %25 : vector<16x1xf32> to vector<16x16xf32>
    %27 = arith.mulf %22, %26 : vector<16x16xf32>
    %28 = arith.addf %3, %27 : vector<16x16xf32>
    %c0_12 = arith.constant 0 : index
    %c0_13 = arith.constant 0 : index
    %c0_14 = arith.constant 0 : index
    %29 = vector.load %arg2[%c0_12, %c0_13, %c0_14] : memref<4x16x8xf32, #tpu.memory_space<vmem>>, vector<1x16x8xf32>
    %30 = vector.shape_cast %29 : vector<1x16x8xf32> to vector<16x8xf32>
    %cst_15 = arith.constant dense<0.000000e+00> : vector<16x8xf32>
    %31 = tpu.matmul %27, %30, %cst_15 {dimension_numbers = #tpu.dot_dimension_numbers<[1], [0], [0], [1], [0, 0, 1, 1], [], []>} : vector<16x16xf32>, vector<16x8xf32>, vector<16x8xf32> -> vector<16x8xf32>
    %cst_16 = arith.constant 0.000000e+00 : f32
    %32 = vector.broadcast %cst_16 : f32 to vector<16x8xf32>
    %33 = arith.maximumf %31, %32 : vector<16x8xf32>
    %c0_17 = arith.constant 0 : index
    %c0_18 = arith.constant 0 : index
    %34 = vector.load %arg5[%c0_17, %c0_18] : memref<16x32xf32, #tpu.memory_space<vmem>>, vector<16x8xf32>
    tpu.vector_store %arg5[%c0_17, %c0_18], %33 {strides = array<i32>} : memref<16x32xf32, #tpu.memory_space<vmem>>, vector<16x8xf32>,
    %c1 = arith.constant 1 : index
    %c0_19 = arith.constant 0 : index
    %c0_20 = arith.constant 0 : index
    %35 = vector.load %arg3[%c1, %c0_19, %c0_20] : memref<4x16x1xf32, #tpu.memory_space<vmem>>, vector<1x16x1xf32>
    %36 = vector.shape_cast %35 : vector<1x16x1xf32> to vector<16x1xf32>
    %c1_21 = arith.constant 1 : index
    %c0_22 = arith.constant 0 : index
    %c0_23 = arith.constant 0 : index
    %37 = vector.load %arg4[%c1_21, %c0_22, %c0_23] : memref<4x1x16xf32, #tpu.memory_space<vmem>>, vector<1x1x16xf32>
    %38 = vector.shape_cast %37 : vector<1x1x16xf32> to vector<1x16xf32>
    %39 = vector.broadcast %36 : vector<16x1xf32> to vector<16x16xf32>
    %40 = vector.broadcast %38 : vector<1x16xf32> to vector<16x16xf32>
    %41 = arith.addf %39, %40 : vector<16x16xf32>
    %cst_24 = arith.constant 0.000000e+00 : f32
    %42 = vector.broadcast %cst_24 : f32 to vector<16x16xf32>
    %43 = arith.cmpf oge, %41, %42 : vector<16x16xf32>
    %cst_25 = arith.constant 2.000000e-01 : f32
    %44 = vector.broadcast %cst_25 : f32 to vector<16x16xf32>
    %45 = arith.mulf %44, %41 : vector<16x16xf32>
    %46 = arith.select %43, %41, %45 : vector<16x16xi1>, vector<16x16xf32>
    %cst_26 = arith.constant 0.000000e+00 : f32
    %47 = vector.broadcast %cst_26 : f32 to vector<16x16xf32>
    %48 = arith.select %2, %46, %47 : vector<16x16xi1>, vector<16x16xf32>
    %cst_27 = arith.constant dense<0xFF800000> : vector<16xf32>
    %49 = vector.multi_reduction <maximumf>, %48, %cst_27 [1] : vector<16x16xf32> to vector<16xf32>
    %50 = vector.shape_cast %49 : vector<16xf32> to vector<16x1xf32>
    %51 = vector.broadcast %50 : vector<16x1xf32> to vector<16x16xf32>
    %52 = arith.subf %48, %51 : vector<16x16xf32>
    %53 = math.exp %52 : vector<16x16xf32>
    %cst_28 = arith.constant dense<0.000000e+00> : vector<16xf32>
    %54 = vector.multi_reduction <add>, %53, %cst_28 [1] : vector<16x16xf32> to vector<16xf32>
    %55 = vector.shape_cast %54 : vector<16xf32> to vector<16x1xf32>
    %56 = tpu.reciprocal %55 : vector<16x1xf32> -> vector<16x1xf32>
    %57 = vector.broadcast %56 : vector<16x1xf32> to vector<16x16xf32>
    %58 = arith.mulf %53, %57 : vector<16x16xf32>
    %59 = arith.addf %28, %58 : vector<16x16xf32>
    %c1_29 = arith.constant 1 : index
    %c0_30 = arith.constant 0 : index
    %c0_31 = arith.constant 0 : index
    %60 = vector.load %arg2[%c1_29, %c0_30, %c0_31] : memref<4x16x8xf32, #tpu.memory_space<vmem>>, vector<1x16x8xf32>
    %61 = vector.shape_cast %60 : vector<1x16x8xf32> to vector<16x8xf32>
    %cst_32 = arith.constant dense<0.000000e+00> : vector<16x8xf32>
    %62 = tpu.matmul %58, %61, %cst_32 {dimension_numbers = #tpu.dot_dimension_numbers<[1], [0], [0], [1], [0, 0, 1, 1], [], []>} : vector<16x16xf32>, vector<16x8xf32>, vector<16x8xf32> -> vector<16x8xf32>
    %cst_33 = arith.constant 0.000000e+00 : f32
    %63 = vector.broadcast %cst_33 : f32 to vector<16x8xf32>
    %64 = arith.maximumf %62, %63 : vector<16x8xf32>
    %c0_34 = arith.constant 0 : index
    %c8 = arith.constant 8 : index
    %65 = vector.load %arg5[%c0_34, %c8] : memref<16x32xf32, #tpu.memory_space<vmem>>, vector<16x8xf32>
    tpu.vector_store %arg5[%c0_34, %c8], %64 {strides = array<i32>} : memref<16x32xf32, #tpu.memory_space<vmem>>, vector<16x8xf32>,
    %c2 = arith.constant 2 : index
    %c0_35 = arith.constant 0 : index
    %c0_36 = arith.constant 0 : index
    %66 = vector.load %arg3[%c2, %c0_35, %c0_36] : memref<4x16x1xf32, #tpu.memory_space<vmem>>, vector<1x16x1xf32>
    %67 = vector.shape_cast %66 : vector<1x16x1xf32> to vector<16x1xf32>
    %c2_37 = arith.constant 2 : index
    %c0_38 = arith.constant 0 : index
    %c0_39 = arith.constant 0 : index
    %68 = vector.load %arg4[%c2_37, %c0_38, %c0_39] : memref<4x1x16xf32, #tpu.memory_space<vmem>>, vector<1x1x16xf32>
    %69 = vector.shape_cast %68 : vector<1x1x16xf32> to vector<1x16xf32>
    %70 = vector.broadcast %67 : vector<16x1xf32> to vector<16x16xf32>
    %71 = vector.broadcast %69 : vector<1x16xf32> to vector<16x16xf32>
    %72 = arith.addf %70, %71 : vector<16x16xf32>
    %cst_40 = arith.constant 0.000000e+00 : f32
    %73 = vector.broadcast %cst_40 : f32 to vector<16x16xf32>
    %74 = arith.cmpf oge, %72, %73 : vector<16x16xf32>
    %cst_41 = arith.constant 2.000000e-01 : f32
    %75 = vector.broadcast %cst_41 : f32 to vector<16x16xf32>
    %76 = arith.mulf %75, %72 : vector<16x16xf32>
    %77 = arith.select %74, %72, %76 : vector<16x16xi1>, vector<16x16xf32>
    %cst_42 = arith.constant 0.000000e+00 : f32
    %78 = vector.broadcast %cst_42 : f32 to vector<16x16xf32>
    %79 = arith.select %2, %77, %78 : vector<16x16xi1>, vector<16x16xf32>
    %cst_43 = arith.constant dense<0xFF800000> : vector<16xf32>
    %80 = vector.multi_reduction <maximumf>, %79, %cst_43 [1] : vector<16x16xf32> to vector<16xf32>
    %81 = vector.shape_cast %80 : vector<16xf32> to vector<16x1xf32>
    %82 = vector.broadcast %81 : vector<16x1xf32> to vector<16x16xf32>
    %83 = arith.subf %79, %82 : vector<16x16xf32>
    %84 = math.exp %83 : vector<16x16xf32>
    %cst_44 = arith.constant dense<0.000000e+00> : vector<16xf32>
    %85 = vector.multi_reduction <add>, %84, %cst_44 [1] : vector<16x16xf32> to vector<16xf32>
    %86 = vector.shape_cast %85 : vector<16xf32> to vector<16x1xf32>
    %87 = tpu.reciprocal %86 : vector<16x1xf32> -> vector<16x1xf32>
    %88 = vector.broadcast %87 : vector<16x1xf32> to vector<16x16xf32>
    %89 = arith.mulf %84, %88 : vector<16x16xf32>
    %90 = arith.addf %59, %89 : vector<16x16xf32>
    %c2_45 = arith.constant 2 : index
    %c0_46 = arith.constant 0 : index
    %c0_47 = arith.constant 0 : index
    %91 = vector.load %arg2[%c2_45, %c0_46, %c0_47] : memref<4x16x8xf32, #tpu.memory_space<vmem>>, vector<1x16x8xf32>
    %92 = vector.shape_cast %91 : vector<1x16x8xf32> to vector<16x8xf32>
    %cst_48 = arith.constant dense<0.000000e+00> : vector<16x8xf32>
    %93 = tpu.matmul %89, %92, %cst_48 {dimension_numbers = #tpu.dot_dimension_numbers<[1], [0], [0], [1], [0, 0, 1, 1], [], []>} : vector<16x16xf32>, vector<16x8xf32>, vector<16x8xf32> -> vector<16x8xf32>
    %cst_49 = arith.constant 0.000000e+00 : f32
    %94 = vector.broadcast %cst_49 : f32 to vector<16x8xf32>
    %95 = arith.maximumf %93, %94 : vector<16x8xf32>
    %c0_50 = arith.constant 0 : index
    %c16 = arith.constant 16 : index
    %96 = vector.load %arg5[%c0_50, %c16] : memref<16x32xf32, #tpu.memory_space<vmem>>, vector<16x8xf32>
    tpu.vector_store %arg5[%c0_50, %c16], %95 {strides = array<i32>} : memref<16x32xf32, #tpu.memory_space<vmem>>, vector<16x8xf32>,
    %c3 = arith.constant 3 : index
    %c0_51 = arith.constant 0 : index
    %c0_52 = arith.constant 0 : index
    %97 = vector.load %arg3[%c3, %c0_51, %c0_52] : memref<4x16x1xf32, #tpu.memory_space<vmem>>, vector<1x16x1xf32>
    %98 = vector.shape_cast %97 : vector<1x16x1xf32> to vector<16x1xf32>
    %c3_53 = arith.constant 3 : index
    %c0_54 = arith.constant 0 : index
    %c0_55 = arith.constant 0 : index
    %99 = vector.load %arg4[%c3_53, %c0_54, %c0_55] : memref<4x1x16xf32, #tpu.memory_space<vmem>>, vector<1x1x16xf32>
    %100 = vector.shape_cast %99 : vector<1x1x16xf32> to vector<1x16xf32>
    %101 = vector.broadcast %98 : vector<16x1xf32> to vector<16x16xf32>
    %102 = vector.broadcast %100 : vector<1x16xf32> to vector<16x16xf32>
    %103 = arith.addf %101, %102 : vector<16x16xf32>
    %cst_56 = arith.constant 0.000000e+00 : f32
    %104 = vector.broadcast %cst_56 : f32 to vector<16x16xf32>
    %105 = arith.cmpf oge, %103, %104 : vector<16x16xf32>
    %cst_57 = arith.constant 2.000000e-01 : f32
    %106 = vector.broadcast %cst_57 : f32 to vector<16x16xf32>
    %107 = arith.mulf %106, %103 : vector<16x16xf32>
    %108 = arith.select %105, %103, %107 : vector<16x16xi1>, vector<16x16xf32>
    %cst_58 = arith.constant 0.000000e+00 : f32
    %109 = vector.broadcast %cst_58 : f32 to vector<16x16xf32>
    %110 = arith.select %2, %108, %109 : vector<16x16xi1>, vector<16x16xf32>
    %cst_59 = arith.constant dense<0xFF800000> : vector<16xf32>
    %111 = vector.multi_reduction <maximumf>, %110, %cst_59 [1] : vector<16x16xf32> to vector<16xf32>
    %112 = vector.shape_cast %111 : vector<16xf32> to vector<16x1xf32>
    %113 = vector.broadcast %112 : vector<16x1xf32> to vector<16x16xf32>
    %114 = arith.subf %110, %113 : vector<16x16xf32>
    %115 = math.exp %114 : vector<16x16xf32>
    %cst_60 = arith.constant dense<0.000000e+00> : vector<16xf32>
    %116 = vector.multi_reduction <add>, %115, %cst_60 [1] : vector<16x16xf32> to vector<16xf32>
    %117 = vector.shape_cast %116 : vector<16xf32> to vector<16x1xf32>
    %118 = tpu.reciprocal %117 : vector<16x1xf32> -> vector<16x1xf32>
    %119 = vector.broadcast %118 : vector<16x1xf32> to vector<16x16xf32>
    %120 = arith.mulf %115, %119 : vector<16x16xf32>
    %121 = arith.addf %90, %120 : vector<16x16xf32>
    %c3_61 = arith.constant 3 : index
    %c0_62 = arith.constant 0 : index
    %c0_63 = arith.constant 0 : index
    %122 = vector.load %arg2[%c3_61, %c0_62, %c0_63] : memref<4x16x8xf32, #tpu.memory_space<vmem>>, vector<1x16x8xf32>
    %123 = vector.shape_cast %122 : vector<1x16x8xf32> to vector<16x8xf32>
    %cst_64 = arith.constant dense<0.000000e+00> : vector<16x8xf32>
    %124 = tpu.matmul %120, %123, %cst_64 {dimension_numbers = #tpu.dot_dimension_numbers<[1], [0], [0], [1], [0, 0, 1, 1], [], []>} : vector<16x16xf32>, vector<16x8xf32>, vector<16x8xf32> -> vector<16x8xf32>
    %cst_65 = arith.constant 0.000000e+00 : f32
    %125 = vector.broadcast %cst_65 : f32 to vector<16x8xf32>
    %126 = arith.maximumf %124, %125 : vector<16x8xf32>
    %c0_66 = arith.constant 0 : index
    %c24 = arith.constant 24 : index
    %127 = vector.load %arg5[%c0_66, %c24] : memref<16x32xf32, #tpu.memory_space<vmem>>, vector<16x8xf32>
    tpu.vector_store %arg5[%c0_66, %c24], %126 {strides = array<i32>} : memref<16x32xf32, #tpu.memory_space<vmem>>, vector<16x8xf32>,
    %cst_67 = arith.constant 2.500000e-01 : f32
    %128 = vector.broadcast %cst_67 : f32 to vector<16x16xf32>
    %129 = arith.mulf %121, %128 : vector<16x16xf32>
    %c0_68 = arith.constant 0 : index
    %c0_69 = arith.constant 0 : index
    %130 = vector.load %arg6[%c0_68, %c0_69] : memref<16x16xf32, #tpu.memory_space<vmem>>, vector<16x16xf32>
    tpu.vector_store %arg6[%c0_68, %c0_69], %129 {strides = array<i32>} : memref<16x16xf32, #tpu.memory_space<vmem>>, vector<16x16xf32>,
    return
  }
  func.func @transform_0(%arg0: i32) -> (i32, i32) {
    %c0_i32 = arith.constant 0 : i32
    %c0_i32_0 = arith.constant 0 : i32
    return %arg0, %c0_i32 : i32, i32
  }
  func.func @transform_1(%arg0: i32) -> (i32, i32, i32) {
    %c0_i32 = arith.constant 0 : i32
    %c0_i32_0 = arith.constant 0 : i32
    %c0_i32_1 = arith.constant 0 : i32
    %c0_i32_2 = arith.constant 0 : i32
    return %c0_i32, %c0_i32_0, %c0_i32_1 : i32, i32, i32
  }
  func.func @transform_2(%arg0: i32) -> (i32, i32, i32) {
    %c0_i32 = arith.constant 0 : i32
    %c0_i32_0 = arith.constant 0 : i32
    %c0_i32_1 = arith.constant 0 : i32
    return %c0_i32, %arg0, %c0_i32_0 : i32, i32, i32
  }
  func.func @transform_3(%arg0: i32) -> (i32, i32, i32) {
    %c0_i32 = arith.constant 0 : i32
    %c0_i32_0 = arith.constant 0 : i32
    %c0_i32_1 = arith.constant 0 : i32
    %c0_i32_2 = arith.constant 0 : i32
    return %c0_i32, %c0_i32_0, %c0_i32_1 : i32, i32, i32
  }
  func.func @transform_4(%arg0: i32) -> (i32, i32) {
    %c0_i32 = arith.constant 0 : i32
    %c0_i32_0 = arith.constant 0 : i32
    return %arg0, %c0_i32 : i32, i32
  }
  func.func @transform_5(%arg0: i32) -> (i32, i32) {
    %c0_i32 = arith.constant 0 : i32
    %c0_i32_0 = arith.constant 0 : i32
    return %arg0, %c0_i32 : i32, i32
  }
}

module attributes {stable_mosaic.version = 11 : i64} {
  func.func @gat_row_tile_kernel(%arg0: i32, %arg1: memref<16x16xi8, #tpu.memory_space<vmem>>, %arg2: memref<4x16x8xf32, #tpu.memory_space<vmem>>, %arg3: memref<4x16x1xf32, #tpu.memory_space<vmem>>, %arg4: memref<4x1x16xf32, #tpu.memory_space<vmem>>, %arg5: memref<16x32xf32, #tpu.memory_space<vmem>>, %arg6: memref<16x16xf32, #tpu.memory_space<vmem>>) attributes {dimension_semantics = [#tpu.dimension_semantics<parallel>], iteration_bounds = array<i64: 1>, scalar_prefetch = 0 : i64, scratch_operands = 0 : i64, tpu.core_type = #tpu.core_type<tc>, window_params = [{transform_indices = @transform_0, window_bounds = array<i64: 16, 16>}, {pipeline_mode = #tpu.pipeline_mode<synchronous>, transform_indices = @transform_1, window_bounds = array<i64: 4, 16, 8>}, {transform_indices = @transform_2, window_bounds = array<i64: 4, 16, 1>}, {pipeline_mode = #tpu.pipeline_mode<synchronous>, transform_indices = @transform_3, window_bounds = array<i64: 4, 1, 16>}, {transform_indices = @transform_4, window_bounds = array<i64: 16, 32>}, {transform_indices = @transform_5, window_bounds = array<i64: 16, 16>}]} {
    %c0 = arith.constant 0 : index
    %c0_0 = arith.constant 0 : index
    %0 = vector.load %arg1[%c0, %c0_0] : memref<16x16xi8, #tpu.memory_space<vmem>>, vector<16x16xi8>
    %c0_i8 = arith.constant 0 : i8
    %1 = vector.broadcast %c0_i8 : i8 to vector<16x16xi8>
    %2 = arith.cmpi ne, %0, %1 : vector<16x16xi8>
    %cst = arith.constant 0.000000e+00 : f32
    %3 = vector.broadcast %cst : f32 to vector<16x16xf32>
    %c0_1 = arith.constant 0 : index
    %c0_2 = arith.constant 0 : index
    %c0_3 = arith.constant 0 : index
    %4 = vector.load %arg3[%c0_1, %c0_2, %c0_3] : memref<4x16x1xf32, #tpu.memory_space<vmem>>, vector<1x16x1xf32>
    %5 = vector.shape_cast %4 : vector<1x16x1xf32> to vector<16x1xf32>
    %c0_4 = arith.constant 0 : index
    %c0_5 = arith.constant 0 : index
    %c0_6 = arith.constant 0 : index
    %6 = vector.load %arg4[%c0_4, %c0_5, %c0_6] : memref<4x1x16xf32, #tpu.memory_space<vmem>>, vector<1x1x16xf32>
    %7 = vector.shape_cast %6 : vector<1x1x16xf32> to vector<1x16xf32>
    %8 = vector.broadcast %5 : vector<16x1xf32> to vector<16x16xf32>
    %9 = vector.broadcast %7 : vector<1x16xf32> to vector<16x16xf32>
    %10 = arith.addf %8, %9 : vector<16x16xf32>
    %cst_7 = arith.constant 0.000000e+00 : f32
    %11 = vector.broadcast %cst_7 : f32 to vector<16x16xf32>
    %12 = arith.cmpf oge, %10, %11 : vector<16x16xf32>
    %cst_8 = arith.constant 2.000000e-01 : f32
    %13 = vector.broadcast %cst_8 : f32 to vector<16x16xf32>
    %14 = arith.mulf %13, %10 : vector<16x16xf32>
    %15 = arith.select %12, %10, %14 : vector<16x16xi1>, vector<16x16xf32>
    %cst_9 = arith.constant 0.000000e+00 : f32
    %16 = vector.broadcast %cst_9 : f32 to vector<16x16xf32>
    %17 = arith.select %2, %15, %16 : vector<16x16xi1>, vector<16x16xf32>
    %cst_10 = arith.constant dense<0xFF800000> : vector<16xf32>
    %18 = vector.multi_reduction <maximumf>, %17, %cst_10 [1] : vector<16x16xf32> to vector<16xf32>
    %19 = vector.shape_cast %18 : vector<16xf32> to vector<16x1xf32>
    %20 = vector.broadcast %19 : vector<16x1xf32> to vector<16x16xf32>
    %21 = arith.subf %17, %20 : vector<16x16xf32>
    %22 = math.exp %21 : vector<16x16xf32>
    %cst_11 = arith.constant dense<0.000000e+00> : vector<16xf32>
    %23 = vector.multi_reduction <add>, %22, %cst_11 [1] : vector<16x16xf32> to vector<16xf32>
    %24 = vector.shape_cast %23 : vector<16xf32> to vector<16x1xf32>
    %25 = tpu.reciprocal %24 : vector<16x1xf32> -> vector<16x1xf32>
    %26 = vector.broadcast %25 : vector<16x1xf32> to vector<16x16xf32>
    %27 = arith.mulf %22, %26 : vector<16x16xf32>
    %28 = arith.addf %3, %27 : vector<16x16xf32>
    %c0_12 = arith.constant 0 : index
    %c0_13 = arith.constant 0 : index
    %c0_14 = arith.constant 0 : index
    %29 = vector.load %arg2[%c0_12, %c0_13, %c0_14] : memref<4x16x8xf32, #tpu.memory_space<vmem>>, vector<1x16x8xf32>
    %30 = vector.shape_cast %29 : vector<1x16x8xf32> to vector<16x8xf32>
    %cst_15 = arith.constant dense<0.000000e+00> : vector<16x8xf32>
    %31 = tpu.matmul %27, %30, %cst_15 {dimension_numbers = #tpu.dot_dimension_numbers<[1], [0], [0], [1], [0, 0, 1, 1], [], []>} : vector<16x16xf32>, vector<16x8xf32>, vector<16x8xf32> -> vector<16x8xf32>
    %cst_16 = arith.constant 0.000000e+00 : f32
    %32 = vector.broadcast %cst_16 : f32 to vector<16x8xf32>
    %33 = arith.maximumf %31, %32 : vector<16x8xf32>
    %c0_17 = arith.constant 0 : index
    %c0_18 = arith.constant 0 : index
    %34 = vector.load %arg5[%c0_17, %c0_18] : memref<16x32xf32, #tpu.memory_space<vmem>>, vector<16x8xf32>
    tpu.vector_store %arg5[%c0_17, %c0_18], %33 {strides = array<i32>} : memref<16x32xf32, #tpu.memory_space<vmem>>, vector<16x8xf32>,
    %c1 = arith.constant 1 : index
    %c0_19 = arith.constant 0 : index
    %c0_20 = arith.constant 0 : index
    %35 = vector.load %arg3[%c1, %c0_19, %c0_20] : memref<4x16x1xf32, #tpu.memory_space<vmem>>, vector<1x16x1xf32>
    %36 = vector.shape_cast %35 : vector<1x16x1xf32> to vector<16x1xf32>
    %c1_21 = arith.constant 1 : index
    %c0_22 = arith.constant 0 : index
    %c0_23 = arith.constant 0 : index
    %37 = vector.load %arg4[%c1_21, %c0_22, %c0_23] : memref<4x1x16xf32, #tpu.memory_space<vmem>>, vector<1x1x16xf32>
    %38 = vector.shape_cast %37 : vector<1x1x16xf32> to vector<1x16xf32>
    %39 = vector.broadcast %36 : vector<16x1xf32> to vector<16x16xf32>
    %40 = vector.broadcast %38 : vector<1x16xf32> to vector<16x16xf32>
    %41 = arith.addf %39, %40 : vector<16x16xf32>
    %cst_24 = arith.constant 0.000000e+00 : f32
    %42 = vector.broadcast %cst_24 : f32 to vector<16x16xf32>
    %43 = arith.cmpf oge, %41, %42 : vector<16x16xf32>
    %cst_25 = arith.constant 2.000000e-01 : f32
    %44 = vector.broadcast %cst_25 : f32 to vector<16x16xf32>
    %45 = arith.mulf %44, %41 : vector<16x16xf32>
    %46 = arith.select %43, %41, %45 : vector<16x16xi1>, vector<16x16xf32>
    %cst_26 = arith.constant 0.000000e+00 : f32
    %47 = vector.broadcast %cst_26 : f32 to vector<16x16xf32>
    %48 = arith.select %2, %46, %47 : vector<16x16xi1>, vector<16x16xf32>
    %cst_27 = arith.constant dense<0xFF800000> : vector<16xf32>
    %49 = vector.multi_reduction <maximumf>, %48, %cst_27 [1] : vector<16x16xf32> to vector<16xf32>
    %50 = vector.shape_cast %49 : vector<16xf32> to vector<16x1xf32>
    %51 = vector.broadcast %50 : vector<16x1xf32> to vector<16x16xf32>
    %52 = arith.subf %48, %51 : vector<16x16xf32>
    %53 = math.exp %52 : vector<16x16xf32>
    %cst_28 = arith.constant dense<0.000000e+00> : vector<16xf32>
    %54 = vector.multi_reduction <add>, %53, %cst_28 [1] : vector<16x16xf32> to vector<16xf32>
    %55 = vector.shape_cast %54 : vector<16xf32> to vector<16x1xf32>
    %56 = tpu.reciprocal %55 : vector<16x1xf32> -> vector<16x1xf32>
    %57 = vector.broadcast %56 : vector<16x1xf32> to vector<16x16xf32>
    %58 = arith.mulf %53, %57 : vector<16x16xf32>
    %59 = arith.addf %28, %58 : vector<16x16xf32>
    %c1_29 = arith.constant 1 : index
    %c0_30 = arith.constant 0 : index
    %c0_31 = arith.constant 0 : index
    %60 = vector.load %arg2[%c1_29, %c0_30, %c0_31] : memref<4x16x8xf32, #tpu.memory_space<vmem>>, vector<1x16x8xf32>
    %61 = vector.shape_cast %60 : vector<1x16x8xf32> to vector<16x8xf32>
    %cst_32 = arith.constant dense<0.000000e+00> : vector<16x8xf32>
    %62 = tpu.matmul %58, %61, %cst_32 {dimension_numbers = #tpu.dot_dimension_numbers<[1], [0], [0], [1], [0, 0, 1, 1], [], []>} : vector<16x16xf32>, vector<16x8xf32>, vector<16x8xf32> -> vector<16x8xf32>
    %cst_33 = arith.constant 0.000000e+00 : f32
    %63 = vector.broadcast %cst_33 : f32 to vector<16x8xf32>
    %64 = arith.maximumf %62, %63 : vector<16x8xf32>
    %c0_34 = arith.constant 0 : index
    %c8 = arith.constant 8 : index
    %65 = vector.load %arg5[%c0_34, %c8] : memref<16x32xf32, #tpu.memory_space<vmem>>, vector<16x8xf32>
    tpu.vector_store %arg5[%c0_34, %c8], %64 {strides = array<i32>} : memref<16x32xf32, #tpu.memory_space<vmem>>, vector<16x8xf32>,
    %c2 = arith.constant 2 : index
    %c0_35 = arith.constant 0 : index
    %c0_36 = arith.constant 0 : index
    %66 = vector.load %arg3[%c2, %c0_35, %c0_36] : memref<4x16x1xf32, #tpu.memory_space<vmem>>, vector<1x16x1xf32>
    %67 = vector.shape_cast %66 : vector<1x16x1xf32> to vector<16x1xf32>
    %c2_37 = arith.constant 2 : index
    %c0_38 = arith.constant 0 : index
    %c0_39 = arith.constant 0 : index
    %68 = vector.load %arg4[%c2_37, %c0_38, %c0_39] : memref<4x1x16xf32, #tpu.memory_space<vmem>>, vector<1x1x16xf32>
    %69 = vector.shape_cast %68 : vector<1x1x16xf32> to vector<1x16xf32>
    %70 = vector.broadcast %67 : vector<16x1xf32> to vector<16x16xf32>
    %71 = vector.broadcast %69 : vector<1x16xf32> to vector<16x16xf32>
    %72 = arith.addf %70, %71 : vector<16x16xf32>
    %cst_40 = arith.constant 0.000000e+00 : f32
    %73 = vector.broadcast %cst_40 : f32 to vector<16x16xf32>
    %74 = arith.cmpf oge, %72, %73 : vector<16x16xf32>
    %cst_41 = arith.constant 2.000000e-01 : f32
    %75 = vector.broadcast %cst_41 : f32 to vector<16x16xf32>
    %76 = arith.mulf %75, %72 : vector<16x16xf32>
    %77 = arith.select %74, %72, %76 : vector<16x16xi1>, vector<16x16xf32>
    %cst_42 = arith.constant 0.000000e+00 : f32
    %78 = vector.broadcast %cst_42 : f32 to vector<16x16xf32>
    %79 = arith.select %2, %77, %78 : vector<16x16xi1>, vector<16x16xf32>
    %cst_43 = arith.constant dense<0xFF800000> : vector<16xf32>
    %80 = vector.multi_reduction <maximumf>, %79, %cst_43 [1] : vector<16x16xf32> to vector<16xf32>
    %81 = vector.shape_cast %80 : vector<16xf32> to vector<16x1xf32>
    %82 = vector.broadcast %81 : vector<16x1xf32> to vector<16x16xf32>
    %83 = arith.subf %79, %82 : vector<16x16xf32>
    %84 = math.exp %83 : vector<16x16xf32>
    %cst_44 = arith.constant dense<0.000000e+00> : vector<16xf32>
    %85 = vector.multi_reduction <add>, %84, %cst_44 [1] : vector<16x16xf32> to vector<16xf32>
    %86 = vector.shape_cast %85 : vector<16xf32> to vector<16x1xf32>
    %87 = tpu.reciprocal %86 : vector<16x1xf32> -> vector<16x1xf32>
    %88 = vector.broadcast %87 : vector<16x1xf32> to vector<16x16xf32>
    %89 = arith.mulf %84, %88 : vector<16x16xf32>
    %90 = arith.addf %59, %89 : vector<16x16xf32>
    %c2_45 = arith.constant 2 : index
    %c0_46 = arith.constant 0 : index
    %c0_47 = arith.constant 0 : index
    %91 = vector.load %arg2[%c2_45, %c0_46, %c0_47] : memref<4x16x8xf32, #tpu.memory_space<vmem>>, vector<1x16x8xf32>
    %92 = vector.shape_cast %91 : vector<1x16x8xf32> to vector<16x8xf32>
    %cst_48 = arith.constant dense<0.000000e+00> : vector<16x8xf32>
    %93 = tpu.matmul %89, %92, %cst_48 {dimension_numbers = #tpu.dot_dimension_numbers<[1], [0], [0], [1], [0, 0, 1, 1], [], []>} : vector<16x16xf32>, vector<16x8xf32>, vector<16x8xf32> -> vector<16x8xf32>
    %cst_49 = arith.constant 0.000000e+00 : f32
    %94 = vector.broadcast %cst_49 : f32 to vector<16x8xf32>
    %95 = arith.maximumf %93, %94 : vector<16x8xf32>
    %c0_50 = arith.constant 0 : index
    %c16 = arith.constant 16 : index
    %96 = vector.load %arg5[%c0_50, %c16] : memref<16x32xf32, #tpu.memory_space<vmem>>, vector<16x8xf32>
    tpu.vector_store %arg5[%c0_50, %c16], %95 {strides = array<i32>} : memref<16x32xf32, #tpu.memory_space<vmem>>, vector<16x8xf32>,
    %c3 = arith.constant 3 : index
    %c0_51 = arith.constant 0 : index
    %c0_52 = arith.constant 0 : index
    %97 = vector.load %arg3[%c3, %c0_51, %c0_52] : memref<4x16x1xf32, #tpu.memory_space<vmem>>, vector<1x16x1xf32>
    %98 = vector.shape_cast %97 : vector<1x16x1xf32> to vector<16x1xf32>
    %c3_53 = arith.constant 3 : index
    %c0_54 = arith.constant 0 : index
    %c0_55 = arith.constant 0 : index
    %99 = vector.load %arg4[%c3_53, %c0_54, %c0_55] : memref<4x1x16xf32, #tpu.memory_space<vmem>>, vector<1x1x16xf32>
    %100 = vector.shape_cast %99 : vector<1x1x16xf32> to vector<1x16xf32>
    %101 = vector.broadcast %98 : vector<16x1xf32> to vector<16x16xf32>
    %102 = vector.broadcast %100 : vector<1x16xf32> to vector<16x16xf32>
    %103 = arith.addf %101, %102 : vector<16x16xf32>
    %cst_56 = arith.constant 0.000000e+00 : f32
    %104 = vector.broadcast %cst_56 : f32 to vector<16x16xf32>
    %105 = arith.cmpf oge, %103, %104 : vector<16x16xf32>
    %cst_57 = arith.constant 2.000000e-01 : f32
    %106 = vector.broadcast %cst_57 : f32 to vector<16x16xf32>
    %107 = arith.mulf %106, %103 : vector<16x16xf32>
    %108 = arith.select %105, %103, %107 : vector<16x16xi1>, vector<16x16xf32>
    %cst_58 = arith.constant 0.000000e+00 : f32
    %109 = vector.broadcast %cst_58 : f32 to vector<16x16xf32>
    %110 = arith.select %2, %108, %109 : vector<16x16xi1>, vector<16x16xf32>
    %cst_59 = arith.constant dense<0xFF800000> : vector<16xf32>
    %111 = vector.multi_reduction <maximumf>, %110, %cst_59 [1] : vector<16x16xf32> to vector<16xf32>
    %112 = vector.shape_cast %111 : vector<16xf32> to vector<16x1xf32>
    %113 = vector.broadcast %112 : vector<16x1xf32> to vector<16x16xf32>
    %114 = arith.subf %110, %113 : vector<16x16xf32>
    %115 = math.exp %114 : vector<16x16xf32>
    %cst_60 = arith.constant dense<0.000000e+00> : vector<16xf32>
    %116 = vector.multi_reduction <add>, %115, %cst_60 [1] : vector<16x16xf32> to vector<16xf32>
    %117 = vector.shape_cast %116 : vector<16xf32> to vector<16x1xf32>
    %118 = tpu.reciprocal %117 : vector<16x1xf32> -> vector<16x1xf32>
    %119 = vector.broadcast %118 : vector<16x1xf32> to vector<16x16xf32>
    %120 = arith.mulf %115, %119 : vector<16x16xf32>
    %121 = arith.addf %90, %120 : vector<16x16xf32>
    %c3_61 = arith.constant 3 : index
    %c0_62 = arith.constant 0 : index
    %c0_63 = arith.constant 0 : index
    %122 = vector.load %arg2[%c3_61, %c0_62, %c0_63] : memref<4x16x8xf32, #tpu.memory_space<vmem>>, vector<1x16x8xf32>
    %123 = vector.shape_cast %122 : vector<1x16x8xf32> to vector<16x8xf32>
    %cst_64 = arith.constant dense<0.000000e+00> : vector<16x8xf32>
    %124 = tpu.matmul %120, %123, %cst_64 {dimension_numbers = #tpu.dot_dimension_numbers<[1], [0], [0], [1], [0, 0, 1, 1], [], []>} : vector<16x16xf32>, vector<16x8xf32>, vector<16x8xf32> -> vector<16x8xf32>
    %cst_65 = arith.constant 0.000000e+00 : f32
    %125 = vector.broadcast %cst_65 : f32 to vector<16x8xf32>
    %126 = arith.maximumf %124, %125 : vector<16x8xf32>
    %c0_66 = arith.constant 0 : index
    %c24 = arith.constant 24 : index
    %127 = vector.load %arg5[%c0_66, %c24] : memref<16x32xf32, #tpu.memory_space<vmem>>, vector<16x8xf32>
    tpu.vector_store %arg5[%c0_66, %c24], %126 {strides = array<i32>} : memref<16x32xf32, #tpu.memory_space<vmem>>, vector<16x8xf32>,
    %cst_67 = arith.constant 2.500000e-01 : f32
    %128 = vector.broadcast %cst_67 : f32 to vector<16x16xf32>
    %129 = arith.mulf %121, %128 : vector<16x16xf32>
    %c0_68 = arith.constant 0 : index
    %c0_69 = arith.constant 0 : index
    %130 = vector.load %arg6[%c0_68, %c0_69] : memref<16x16xf32, #tpu.memory_space<vmem>>, vector<16x16xf32>
    tpu.vector_store %arg6[%c0_68, %c0_69], %129 {strides = array<i32>} : memref<16x16xf32, #tpu.memory_space<vmem>>, vector<16x16xf32>,
    return
  }
  func.func @transform_0(%arg0: i32) -> (i32, i32) {
    %c0_i32 = arith.constant 0 : i32
    %c0_i32_0 = arith.constant 0 : i32
    return %arg0, %c0_i32 : i32, i32
  }
  func.func @transform_1(%arg0: i32) -> (i32, i32, i32) {
    %c0_i32 = arith.constant 0 : i32
    %c0_i32_0 = arith.constant 0 : i32
    %c0_i32_1 = arith.constant 0 : i32
    %c0_i32_2 = arith.constant 0 : i32
    return %c0_i32, %c0_i32_0, %c0_i32_1 : i32, i32, i32
  }
  func.func @transform_2(%arg0: i32) -> (i32, i32, i32) {
    %c0_i32 = arith.constant 0 : i32
    %c0_i32_0 = arith.constant 0 : i32
    %c0_i32_1 = arith.constant 0 : i32
    return %c0_i32, %arg0, %c0_i32_0 : i32, i32, i32
  }
  func.func @transform_3(%arg0: i32) -> (i32, i32, i32) {
    %c0_i32 = arith.constant 0 : i32
    %c0_i32_0 = arith.constant 0 : i32
    %c0_i32_1 = arith.constant 0 : i32
    %c0_i32_2 = arith.constant 0 : i32
    return %c0_i32, %c0_i32_0, %c0_i32_1 : i32, i32, i32
  }
  func.func @transform_4(%arg0: i32) -> (i32, i32) {
    %c0_i32 = arith.constant 0 : i32
    %c0_i32_0 = arith.constant 0 : i32
    return %arg0, %c0_i32 : i32, i32
  }
  func.func @transform_5(%arg0: i32) -> (i32, i32) {
    %c0_i32 = arith.constant 0 : i32
    %c0_i32_0 = arith.constant 0 : i32
    return %arg0, %c0_i32 : i32, i32
  }
}

</mosaic_0001>

<bundles_post_ra>
// kernel: tpu_custom_call.1
= control target key start
LH: loop header
LB: loop body
LE: loop exit
PB: predicated region body
PF: predicated region fallthrough
CT: control target
= control target key end

     0   :  { %11 = vsyncpa [#allocation3], 0  ;;  %v843_v2 = vmov 0   ;;  %s1040_s0 = inlined_call_operand.vmem [shape: s8[16,16], index: 0, kind: input, shape index: {}]   ;;  %s1041_s1 = inlined_call_operand.vmem [shape: f32[4,16,8], index: 1, kind: input, shape index: {}]   ;;  %s1042_s2 = inlined_call_operand.vmem [shape: f32[4,16,1], index: 2, kind: input, shape index: {}]   ;;  %s1043_s3 = inlined_call_operand.vmem [shape: f32[4,1,16], index: 3, kind: input, shape index: {}]   ;;  %s1044_s4 = inlined_call_operand.hbm [shape: f32[16,32], index: 4, kind: output, shape index: {0}]   ;;  %s1045_s5 = inlined_call_operand.hbm [shape: f32[16,16], index: 5, kind: output, shape index: {1}]  }
   0x1   :  { %v670_v0 = vld [vmem:[%s1042_s2 + $0x10] sm:$0xff]  ;;  %v27_v1 = vld [vmem:[%s1042_s2] sm:$0xff]  ;;  %762 = vset.pattern.permute.xlu1 %v843_v2  ;;  %761 = vset.pattern.permute.xlu0 %v843_v2  ;;  %v671_v3 = vld [vmem:[%s1042_s2 + $0x18] sm:$0xff] }
   0x2   :  { %182 = vperm.xlu1 %762, %v670_v0   ;;  %32 = vperm.xlu0 %761, %v27_v1   ;;  %v28_v4 = vld [vmem:[%s1042_s2 + $0x8] sm:$0xff] }
   0x3   :  { %12 = vsyncpa [#allocation5], 0  ;;  %v679_v5 = vld [vmem:[%s1042_s2 + $0x28] sm:$0xff]  ;;  %v678_v6 = vld [vmem:[%s1042_s2 + $0x20] sm:$0xff]  ;;  %vm62_vm5 = vcmask 130048   ;;  %vm172_vm13 = vcmask 64512  }
   0x4   :  { %v687_v7 = vld [vmem:[%s1042_s2 + $0x38] sm:$0xff]  ;;  %v686_v8 = vld [vmem:[%s1042_s2 + $0x30] sm:$0xff]  ;;  %v23_v9 = vld [vmem:[%s1040_s0] sm:$0x3]  ;;  %s845_s10 = smov 8  }
   0x5   :  { %vm25_vm0 = vnez %v23_v9  ;;  %v24_v10 = vld [vmem:[%s1040_s0 + $0x2] sm:$0x3]  ;;  %v673_v12 = vld [vmem:[%s1043_s3 + $0x1] ss:$0 sm:$0xff]  ;;  %v667_v13 = vld [vmem:[%s1043_s3] ss:$0 sm:$0xff] }
   0x6   :  { %187 = vperm.xlu1 %762, %v671_v3   ;;  %37 = vperm.xlu0 %761, %v28_v4   ;;  %v54_v11 = vsel %vm25_vm0, 16843009, %v843_v2  ;;  %vm26_vm1 = vnez %v24_v10  ;;  %v681_v30 = vld [vmem:[%s1043_s3 + $0x2] ss:$0 sm:$0xff]  ;;  %v689_v43 = vld [vmem:[%s1043_s3 + $0x3] ss:$0 sm:$0xff] }
   0x7   :  { %v56_v14 = vunpack.c.0.s8 %v54_v11  ;;  %v55_v15 = vsel %vm26_vm1, 16843009, %v843_v2 }
   0x8   :  { %v57_v21 = vunpack.c.0.s8 %v55_v15 }
   0x9   :  { %vm916_vm2 = vcmp.ne.s32.totalorder %v56_v14, 0 }
   0xa   :  { %339 = vperm.xlu1 %762, %v679_v5   ;;  %334 = vperm.xlu0 %761, %v678_v6   ;;  %vm925_vm6 = vcmp.ne.s32.totalorder %v57_v21, 0 }
   0xe   :  { %491 = vperm.xlu1 %762, %v687_v7   ;;  %486 = vperm.xlu0 %761, %v686_v8  }
  0x81   :  { %v183_v16 = vpop.permute.xlu1 %182  ;;  %v33_v17 = vpop.permute.xlu0 %32 }
  0x82   :  { %v196_v18 = vadd.f32 %v673_v12, %v183_v16  ;;  %v46_v19 = vadd.f32 %v667_v13, %v33_v17 }
  0x84   :  { %v200_v22 = vmul.f32 0.2, %v196_v18  ;;  %v50_v23 = vmul.f32 0.2, %v46_v19  ;;  %vm48_vm3 = vcmp.ge.f32.partialorder %v46_v19, 0.0  ;;  %vm198_vm4 = vcmp.ge.f32.partialorder %v196_v18, 0.0 }
  0x85   :  { %v188_v24 = vpop.permute.xlu1 %187  ;;  %v38_v25 = vpop.permute.xlu0 %37 }
  0x86   :  { %v197_v26 = vadd.f32 %v673_v12, %v188_v24  ;;  %v47_v27 = vadd.f32 %v667_v13, %v38_v25  ;;  %v52_v28 = vsel %vm48_vm3, %v46_v19, %v50_v23  ;;  %v202_v29 = vsel %vm198_vm4, %v196_v18, %v200_v22 }
  0x87   :  { %v60_v31 = vsel %vm916_vm2, %v52_v28, 0.0  ;;  %v204_v33 = vsel %vm916_vm2, %v202_v29, 0.0 }
  0x88   :  { %v201_v34 = vmul.f32 0.2, %v197_v26  ;;  %v51_v35 = vmul.f32 0.2, %v47_v27  ;;  %v63_v36 = vsel %vm62_vm5, %v60_v31, -inf  ;;  %vm49_vm7 = vcmp.ge.f32.partialorder %v47_v27, 0.0 }
  0x89   :  { %v340_v37 = vpop.permute.xlu1 %339  ;;  %v335_v38 = vpop.permute.xlu0 %334  ;;  %64 = vmax.xlane.f32.xlu0 %v63_v36  ;;  %vm199_vm8 = vcmp.ge.f32.partialorder %v197_v26, 0.0  ;;  %v206_v45 = vsel %vm62_vm5, %v204_v33, -inf }
  0x8a   :  { %v349_v39 = vadd.f32 %v681_v30, %v340_v37  ;;  %v348_v40 = vadd.f32 %v681_v30, %v335_v38  ;;  %v53_v41 = vsel %vm49_vm7, %v47_v27, %v51_v35  ;;  %v203_v42 = vsel %vm199_vm8, %v197_v26, %v201_v34 }
  0x8b   :  { %v61_v44 = vsel %vm925_vm6, %v53_v41, 0.0  ;;  %v205_v46 = vsel %vm925_vm6, %v203_v42, 0.0 }
  0x8c   :  { %v353_v47 = vmul.f32 0.2, %v349_v39  ;;  %v352_v48 = vmul.f32 0.2, %v348_v40  ;;  %v66_v49 = vsel %vm62_vm5, %v61_v44, -inf  ;;  %vm350_vm9 = vcmp.ge.f32.partialorder %v348_v40, 0.0 }
  0x8d   :  { %v492_v50 = vpop.permute.xlu1 %491  ;;  %v487_v51 = vpop.permute.xlu0 %486  ;;  %67 = vmax.xlane.f32.xlu1 %v66_v49  ;;  %207 = vmax.xlane.f32.xlu0 %v206_v45  ;;  %vm351_vm10 = vcmp.ge.f32.partialorder %v349_v39, 0.0  ;;  %v209_v57 = vsel %vm62_vm5, %v205_v46, -inf  ;;  %v87_v45 = vld [vmem:[%s1041_s1] sm:$0xff]  ;;  %v675_v49 = vld [vmem:[%s1041_s1 + $0x18] sm:$0xff] }
  0x8e   :  { %v501_v52 = vadd.f32 %v689_v43, %v492_v50  ;;  %v500_v53 = vadd.f32 %v689_v43, %v487_v51  ;;  %v354_v54 = vsel %vm350_vm9, %v348_v40, %v352_v48  ;;  %v355_v55 = vsel %vm351_vm10, %v349_v39, %v353_v47  ;;  %v674_v48 = vld [vmem:[%s1041_s1 + $0x10] sm:$0xff]  ;;  %v682_v51 = vld [vmem:[%s1041_s1 + $0x20] sm:$0xff] }
  0x8f   :  { %v356_v56 = vsel %vm916_vm2, %v354_v54, 0.0  ;;  %v357_v61 = vsel %vm925_vm6, %v355_v55, 0.0  ;;  %v742_v50 = vpack.c.bf16 %v675_v49, %v674_v48  ;;  %v690_v54 = vld [vmem:[%s1041_s1 + $0x30] sm:$0xff]  ;;  %v691_v55 = vld [vmem:[%s1041_s1 + $0x38] sm:$0xff] }
  0x90   :  { %v505_v58 = vmul.f32 0.2, %v501_v52  ;;  %v504_v59 = vmul.f32 0.2, %v500_v53  ;;  %v358_v60 = vsel %vm62_vm5, %v356_v56, -inf  ;;  %vm502_vm11 = vcmp.ge.f32.partialorder %v500_v53, 0.0 }
  0x91   :  { %359 = vmax.xlane.f32.xlu1 %v358_v60  ;;  %210 = vmax.xlane.f32.xlu0 %v209_v57  ;;  %vm503_vm12 = vcmp.ge.f32.partialorder %v501_v52, 0.0  ;;  %v361_v2 = vsel %vm62_vm5, %v357_v61, -inf }
  0x92   :  { %v506_v62 = vsel %vm502_vm11, %v500_v53, %v504_v59  ;;  %v507_v63 = vsel %vm503_vm12, %v501_v52, %v505_v58  ;;  %743 = vmatprep.subr.bf16.mxu1 %v742_v50  ;;  %v683_v52 = vld [vmem:[%s1041_s1 + $0x28] sm:$0xff] }
  0x93   :  { %v508_v0 = vsel %vm916_vm2, %v506_v62, 0.0  ;;  %v509_v3 = vsel %vm925_vm6, %v507_v63, 0.0  ;;  %745 = vmatpush3.bf16.msra.mxu1 %v742_v50  ;;  %v746_v53 = vpack.c.bf16 %v683_v52, %v682_v51 }
  0x94   :  { %v510_v1 = vsel %vm62_vm5, %v508_v0, -inf  ;;  %v513_v4 = vsel %vm62_vm5, %v509_v3, -inf }
  0x95   :  { %511 = vmax.xlane.f32.xlu1 %v510_v1  ;;  %362 = vmax.xlane.f32.xlu0 %v361_v2 }
  0x99   :  { %514 = vmax.xlane.f32.xlu0 %v513_v4 }
 0x116   :  { %v65_v5 = vpop.xlane.xlu0 %64 }
 0x117   :  { %v69_v6 = vsub.f32 %v60_v31, %v65_v5 }
 0x119   :  { %v71_v7 = vmul.f32 1.442695, %v69_v6 }
 0x11a   :  { %v68_v8 = vpop.xlane.xlu1 %67  ;;  %v208_v9 = vpop.xlane.xlu0 %207 }
 0x11b   :  { %763 = vpow2.f32 %v71_v7  ;;  %v70_v10 = vsub.f32 %v61_v44, %v68_v8  ;;  %v212_v11 = vsub.f32 %v204_v33, %v208_v9 }
 0x11d   :  { %v73_v12 = vmul.f32 1.442695, %v70_v10  ;;  %v214_v13 = vmul.f32 1.442695, %v212_v11 }
 0x11e   :  { %v360_v14 = vpop.xlane.xlu1 %359  ;;  %v211_v15 = vpop.xlane.xlu0 %210 }
 0x11f   :  { %765 = vpow2.f32 %v73_v12  ;;  %v364_v16 = vsub.f32 %v356_v56, %v360_v14  ;;  %v213_v17 = vsub.f32 %v205_v46, %v211_v15  ;;  %v88_v46 = vld [vmem:[%s1041_s1 + $0x8] sm:$0xff]  ;;  %v750_v56 = vpack.c.bf16 %v691_v55, %v690_v54  ;;  %s844_s1 = smov [#allocation4]  }
 0x120   :  { %767 = vpow2.f32 %v214_v13  ;;  %v738_v47 = vpack.c.bf16 %v88_v46, %v87_v45  ;;  %s652_s9 = sshll.u32 %s844_s1, 4  ;;  %s653_s9 = int_to_ptr.vmem [resolvable:$true] %s652_s9 }
 0x121   :  { %v366_v18 = vmul.f32 1.442695, %v364_v16  ;;  %v216_v19 = vmul.f32 1.442695, %v213_v17  ;;  %751 = vmatprep.subr.bf16.mxu1 %v750_v56  ;;  %s795_s11 = scalar_lea.vmem %s653_s9, 256  ;;  %p800_p1 = scmp.lt.s32.totalorder %s653_s9, %s653_s9 }
 0x122   :  { %v512_v20 = vpop.xlane.xlu1 %511  ;;  %v363_v21 = vpop.xlane.xlu0 %362  ;;  %739 = vmatprep.subr.bf16.mxu0 %v738_v47  ;;  %p796_p0 = scmp.ne.s32.totalorder %s653_s9, %s795_s11  ;;  %p801_p2 = scmp.lt.s32.totalorder %s795_s11, %s795_s11 }
 0x123   :  { %769 = vpow2.f32 %v366_v18  ;;  %v516_v22 = vsub.f32 %v508_v0, %v512_v20  ;;  %v365_v23 = vsub.f32 %v357_v61, %v363_v21  ;;  %741 = vmatpush3.bf16.msra.mxu0 %v738_v47 }
 0x124   :  { %771 = vpow2.f32 %v216_v19  ;;  %747 = vmatprep.subr.bf16.mxu0 %v746_v53  ;;  %p802_p3 = por %p801_p2, %p800_p1 }
 0x125   :  { %v764_v24 = vpop.eup %763  ;;  %v518_v25 = vmul.f32 1.442695, %v516_v22  ;;  %v368_v26 = vmul.f32 1.442695, %v365_v23 }
 0x126   :  { %v515_v27 = vpop.xlane.xlu0 %514  ;;  %v75_v28 = vsel %vm62_vm5, %v764_v24, 0.0  ;;  %p803_p4 = pnand %p802_p3, %p796_p0 }
 0x127   :  { %773 = vpow2.f32 %v518_v25  ;;  %v517_v29 = vsub.f32 %v509_v3, %v515_v27  ;;  %76 = vadd.xlane.f32.xlu1 %v75_v28 }
 0x128   :  { %775 = vpow2.f32 %v368_v26 }
 0x129   :  { %v766_v30 = vpop.eup %765  ;;  %v520_v31 = vmul.f32 1.442695, %v517_v29 }
 0x12a   :  { %v768_v32 = vpop.eup %767  ;;  %v78_v33 = vsel %vm62_vm5, %v766_v30, 0.0 }
 0x12b   :  { %777 = vpow2.f32 %v520_v31  ;;  %79 = vadd.xlane.f32.xlu0 %v78_v33  ;;  %v218_v34 = vsel %vm62_vm5, %v768_v32, 0.0 }
 0x12c   :  { %219 = vadd.xlane.f32.xlu1 %v218_v34 }
 0x12d   :  { %v770_v35 = vpop.eup %769 }
 0x12e   :  { %v772_v36 = vpop.eup %771  ;;  %v370_v37 = vsel %vm62_vm5, %v770_v35, 0.0 }
 0x12f   :  { %v221_v38 = vsel %vm62_vm5, %v772_v36, 0.0 }
 0x130   :  { %371 = vadd.xlane.f32.xlu1 %v370_v37  ;;  %222 = vadd.xlane.f32.xlu0 %v221_v38 }
 0x131   :  { %v959_v39 = vpop.eup %773 }
 0x132   :  { %v961_v40 = vpop.eup %775  ;;  %v522_v41 = vsel %vm62_vm5, %v959_v39, 0.0 }
 0x133   :  { %v373_v42 = vsel %vm62_vm5, %v961_v40, 0.0 }
 0x134   :  { %523 = vadd.xlane.f32.xlu1 %v522_v41  ;;  %374 = vadd.xlane.f32.xlu0 %v373_v42 }
 0x135   :  { %v967_v43 = vpop.eup %777 }
 0x136   :  { %v525_v44 = vsel %vm62_vm5, %v967_v43, 0.0 }
 0x138   :  { %526 = vadd.xlane.f32.xlu0 %v525_v44 }
 0x1b4   :  { %v77_v57 = vpop.xlane.xlu1 %76 }
 0x1b5   :  { %779 = vrcp.f32 %v77_v57 }
 0x1b8   :  { %v80_v58 = vpop.xlane.xlu0 %79 }
 0x1b9   :  { %v220_v59 = vpop.xlane.xlu1 %219  ;;  %781 = vrcp.f32 %v80_v58 }
 0x1ba   :  { %783 = vrcp.f32 %v220_v59 }
 0x1bd   :  { %v372_v60 = vpop.xlane.xlu1 %371  ;;  %v223_v61 = vpop.xlane.xlu0 %222 }
 0x1be   :  { %785 = vrcp.f32 %v372_v60 }
 0x1bf   :  { %v780_v62 = vpop.eup %779  ;;  %787 = vrcp.f32 %v223_v61 }
 0x1c0   :  { %v83_v63 = vmul.f32 %v780_v62, %v764_v24 }
 0x1c1   :  { %v524_v0 = vpop.xlane.xlu1 %523  ;;  %v375_v1 = vpop.xlane.xlu0 %374 }
 0x1c2   :  { %789 = vrcp.f32 %v524_v0  ;;  %714 = vmatprep.mubr.msk.f32.mxu0 %vm62_vm5, %v83_v63 }
 0x1c3   :  { %v782_v2 = vpop.eup %781  ;;  %791 = vrcp.f32 %v375_v1 }
 0x1c4   :  { %v784_v3 = vpop.eup %783  ;;  %v84_v4 = vmul.f32 %v782_v2, %v766_v30 }
 0x1c5   :  { %v527_v5 = vpop.xlane.xlu0 %526  ;;  %v226_v6 = vmul.f32 %v784_v3, %v768_v32 }
 0x1c6   :  { %793 = vrcp.f32 %v527_v5  ;;  %715 = vmatmul.mubr.msk.f32.vlgmr.msra.gmra.mrb[0].mxu0 %vm62_vm5, %v84_v4 }
 0x1c7   :  { %721 = vmatprep.mubr.msk.f32.mxu1 %vm62_vm5, %v226_v6  ;;  %749 = vmatpush3.bf16.msra.mxu0 %v746_v53  ;;  %v228_v11 = vadd.f32 %v226_v6, %v83_v63 }
 0x1c8   :  { %v786_v7 = vpop.eup %785 }
 0x1c9   :  { %v788_v8 = vpop.eup %787  ;;  %v378_v9 = vmul.f32 %v786_v7, %v770_v35 }
 0x1ca   :  { %v227_v10 = vmul.f32 %v788_v8, %v772_v36 }
 0x1cb   :  { %728 = vmatprep.mubr.msk.f32.mxu0 %vm62_vm5, %v378_v9  ;;  %v380_v14 = vadd.f32 %v378_v9, %v228_v11 }
 0x1cc   :  { %v790_v12 = vpop.eup %789  ;;  %722 = vmatmul.mubr.msk.f32.vlgmr.msra.gmra.mrb[0].mxu1 %vm62_vm5, %v227_v10  ;;  %v229_v18 = vadd.f32 %v227_v10, %v84_v4 }
 0x1cd   :  { %v792_v13 = vpop.eup %791  ;;  %v530_v15 = vmul.f32 %v790_v12, %v959_v39  ;;  %753 = vmatpush3.bf16.msra.mxu1 %v750_v56 }
 0x1ce   :  { %v379_v16 = vmul.f32 %v792_v13, %v961_v40 }
 0x1cf   :  { %v532_v17 = vadd.f32 %v530_v15, %v380_v14  ;;  %735 = vmatprep.mubr.msk.f32.mxu1 %vm62_vm5, %v530_v15 }
 0x1d0   :  { %v794_v19 = vpop.eup %793  ;;  %729 = vmatmul.mubr.msk.f32.vlgmr.msra.gmra.mrb[2].mxu0 %vm62_vm5, %v379_v16  ;;  %v381_v22 = vadd.f32 %v379_v16, %v229_v18 }
 0x1d1   :  { %v531_v20 = vmul.f32 %v794_v19, %v967_v43  ;;  %v631_v21 = vmul.f32 0.25, %v532_v17 }
 0x1d3   :  { %633 = vst.msk [vmem:[#allocation4] sm:$0xff] %vm62_vm5, %v631_v21  ;;  %736 = vmatmul.mubr.msk.f32.vlgmr.msra.gmra.mrb[2].mxu1 %vm62_vm5, %v531_v20  ;;  %v533_v23 = vadd.f32 %v531_v20, %v381_v22 }
 0x1d5   :  { %v632_v24 = vmul.f32 0.25, %v533_v23 }
 0x1d7   :  { %634 = vst.msk [vmem:[#allocation4 + $0x8] sm:$0xff] %vm62_vm5, %v632_v24 }
 0x299   :  { %v716_v25 = vpop.f32.mrb[0].mxu0 }
 0x29a   :  { %v171_v26 = vmax.f32 %v716_v25, 0.0  ;;  %v161_v27 = vpop.f32.mrb[1].mxu0 }
 0x29b   :  { %v170_v28 = vmax.f32 %v161_v27, 0.0 }
 0x29c   :  { %174 = vst.msk [vmem:[#allocation2 + $0x8] sm:$0xff] %vm172_vm13, %v171_v26 }
 0x29d   :  { %173 = vst.msk [vmem:[#allocation2] sm:$0xff] %vm172_vm13, %v170_v28 }
 0x29f   :  { %v723_v29 = vpop.f32.mrb[0].mxu1 }
 0x2a0   :  { %v315_v30 = vmax.f32 %v723_v29, 0.0  ;;  %v305_v31 = vpop.f32.mrb[1].mxu1 }
 0x2a1   :  { %v314_v32 = vmax.f32 %v305_v31, 0.0 }
 0x2a2   :  { %320 = vrot.lane.b32.xlu0 %v315_v30, %s845_s10 }
 0x2a3   :  { %318 = vrot.lane.b32.xlu1 %v314_v32, %s845_s10  ;;  %v730_v33 = vpop.f32.mrb[2].mxu0 }
 0x2a4   :  { %v467_v34 = vmax.f32 %v730_v33, 0.0  ;;  %v457_v35 = vpop.f32.mrb[3].mxu0 }
 0x2a5   :  { %806 = shalt.err (!%p803_p4)
}
 0x2a6   :  { %s807_s14 = scalar_lea.hbm %s1045_s5, 256 }
 0x2a7   :  { %p808_p5 = scmp.ne.s32.totalorder %s1045_s5, %s807_s14  ;;  %p811_p6 = scmp.lt.u32.totalorder %s807_s14, %s1045_s5 }
 0x2a9   :  { %p813_p7 = pnand %p811_p6, %p808_p5 }
 0x2ab   :  { %816 = shalt.err (!%p813_p7)
}
 0x2ac   :  { %s846_s17 = smov 128   ;;  %v737_v36 = vpop.f32.mrb[2].mxu1  ;;  %s847_s19 = smov 16   ;;  %v466_v39 = vmax.f32 %v457_v35, 0.0  ;;  %vm324_vm14 = vcmask 130112   ;;  %vm476_vm15 = vcmask 195712  }
 0x2ad   :  { %658 = dma.vmem_to_hbm [thread:$0]  %s653_s9, 256, %s1045_s5, [#allocation5], %s846_s17, %s846_s17, %s845_s10   ;;  %v609_v37 = vpop.f32.mrb[3].mxu1  ;;  %v619_v40 = vmax.f32 %v737_v36, 0.0  ;;  %vm628_vm0 = vcmask 261312  }
 0x2ae   :  { %472 = vrot.lane.b32.xlu1 %v467_v34, %s847_s19  ;;  %v618_v38 = vmax.f32 %v609_v37, 0.0  ;;  %s848_s20 = smov 24   ;;  %s849_s5 = smov [#allocation2]  }
 0x2af   :  { %s640_s21 = sshll.u32 %s849_s5, 4  ;;  %s641_s21 = int_to_ptr.vmem [resolvable:$true] %s640_s21 }
 0x2b0   :  { %622 = vrot.lane.b32.xlu0 %v618_v38, %s848_s20  ;;  %s817_s22 = scalar_lea.vmem %s641_s21, 256  ;;  %p822_p9 = scmp.lt.s32.totalorder %s641_s21, %s641_s21 }
 0x2b1   :  { %p818_p8 = scmp.ne.s32.totalorder %s641_s21, %s817_s22  ;;  %p823_p10 = scmp.lt.s32.totalorder %s817_s22, %s817_s22 }
 0x2b2   :  { %470 = vrot.lane.b32.xlu1 %v466_v39, %s847_s19 }
 0x2b3   :  { %p824_p11 = por %p823_p10, %p822_p9 }
 0x2b5   :  { %p825_p12 = pnand %p824_p11, %p818_p8 }
 0x2b6   :  { %624 = vrot.lane.b32.xlu1 %v619_v40, %s848_s20 }
 0x314   :  { %v321_v41 = vpop.permute.xlu0 %320 }
 0x315   :  { %326 = vst.msk [vmem:[#allocation2 + $0x8] sm:$0xff] %vm324_vm14, %v321_v41  ;;  %v319_v42 = vpop.permute.xlu1 %318 }
 0x316   :  { %325 = vst.msk [vmem:[#allocation2] sm:$0xff] %vm324_vm14, %v319_v42 }
 0x320   :  { %v473_v43 = vpop.permute.xlu1 %472 }
 0x321   :  { %478 = vst.msk [vmem:[#allocation2 + $0x8] sm:$0xff] %vm476_vm15, %v473_v43 }
 0x322   :  { %v623_v44 = vpop.permute.xlu0 %622 }
 0x324   :  { %v471_v45 = vpop.permute.xlu1 %470 }
 0x325   :  { %477 = vst.msk [vmem:[#allocation2] sm:$0xff] %vm476_vm15, %v471_v45 }
 0x326   :  { %629 = vst.msk [vmem:[#allocation2] sm:$0xff] %vm628_vm0, %v623_v44 }
 0x328   :  { %v625_v46 = vpop.permute.xlu1 %624 }
 0x329   :  { %630 = vst.msk [vmem:[#allocation2 + $0x8] sm:$0xff] %vm628_vm0, %v625_v46 }
 0x32a   :  { %828 = shalt.err (!%p825_p12)
}
 0x32b   :  { %s829_s25 = scalar_lea.hbm %s1044_s4, 256 }
 0x32c   :  { %p830_p13 = scmp.ne.s32.totalorder %s1044_s4, %s829_s25  ;;  %p833_p0 = scmp.lt.u32.totalorder %s829_s25, %s1044_s4 }
 0x32e   :  { %p835_p1 = pnand %p833_p0, %p830_p13 }
 0x330   :  { %838 = shalt.err (!%p835_p1)
}
 0x331   :  { %646 = dma.vmem_to_hbm [thread:$0]  %s641_s21, 256, %s1044_s4, [#allocation3], %s846_s17, %s846_s17, %s845_s10  }
 0x332   :  { %839 = dma.done.wait [#allocation3], 256  }
 0x333   :  { %840 = vsyncadd [#allocation3], 4294967040 }
 0x334   :  { %841 = dma.done.wait [#allocation5], 256  }
 0x335   :  { %842 = vsyncadd [#allocation5], 4294967040 }
 0x336   :  { %665 = vsyncpa [#allocation3], 1 }
 0x337   :  { %666 = vsyncpa [#allocation5], 1 }

// kernel: tpu_custom_call.1
= control target key start
LH: loop header
LB: loop body
LE: loop exit
PB: predicated region body
PF: predicated region fallthrough
CT: control target
= control target key end

     0   :  { %11 = vsyncpa [#allocation3], 0  ;;  %v843_v2 = vmov 0   ;;  %s1040_s0 = inlined_call_operand.vmem [shape: s8[16,16], index: 0, kind: input, shape index: {}]   ;;  %s1041_s1 = inlined_call_operand.vmem [shape: f32[4,16,8], index: 1, kind: input, shape index: {}]   ;;  %s1042_s2 = inlined_call_operand.vmem [shape: f32[4,16,1], index: 2, kind: input, shape index: {}]   ;;  %s1043_s3 = inlined_call_operand.vmem [shape: f32[4,1,16], index: 3, kind: input, shape index: {}]   ;;  %s1044_s4 = inlined_call_operand.hbm [shape: f32[16,32], index: 4, kind: output, shape index: {0}]   ;;  %s1045_s5 = inlined_call_operand.hbm [shape: f32[16,16], index: 5, kind: output, shape index: {1}]  }
   0x1   :  { %v670_v0 = vld [vmem:[%s1042_s2 + $0x10] sm:$0xff]  ;;  %v27_v1 = vld [vmem:[%s1042_s2] sm:$0xff]  ;;  %762 = vset.pattern.permute.xlu1 %v843_v2  ;;  %761 = vset.pattern.permute.xlu0 %v843_v2  ;;  %v671_v3 = vld [vmem:[%s1042_s2 + $0x18] sm:$0xff] }
   0x2   :  { %182 = vperm.xlu1 %762, %v670_v0   ;;  %32 = vperm.xlu0 %761, %v27_v1   ;;  %v28_v4 = vld [vmem:[%s1042_s2 + $0x8] sm:$0xff] }
   0x3   :  { %12 = vsyncpa [#allocation5], 0  ;;  %v679_v5 = vld [vmem:[%s1042_s2 + $0x28] sm:$0xff]  ;;  %v678_v6 = vld [vmem:[%s1042_s2 + $0x20] sm:$0xff]  ;;  %vm62_vm5 = vcmask 130048   ;;  %vm172_vm13 = vcmask 64512  }
   0x4   :  { %v687_v7 = vld [vmem:[%s1042_s2 + $0x38] sm:$0xff]  ;;  %v686_v8 = vld [vmem:[%s1042_s2 + $0x30] sm:$0xff]  ;;  %v23_v9 = vld [vmem:[%s1040_s0] sm:$0x3]  ;;  %s845_s10 = smov 8  }
   0x5   :  { %vm25_vm0 = vnez %v23_v9  ;;  %v24_v10 = vld [vmem:[%s1040_s0 + $0x2] sm:$0x3]  ;;  %v673_v12 = vld [vmem:[%s1043_s3 + $0x1] ss:$0 sm:$0xff]  ;;  %v667_v13 = vld [vmem:[%s1043_s3] ss:$0 sm:$0xff] }
   0x6   :  { %187 = vperm.xlu1 %762, %v671_v3   ;;  %37 = vperm.xlu0 %761, %v28_v4   ;;  %v54_v11 = vsel %vm25_vm0, 16843009, %v843_v2  ;;  %vm26_vm1 = vnez %v24_v10  ;;  %v681_v30 = vld [vmem:[%s1043_s3 + $0x2] ss:$0 sm:$0xff]  ;;  %v689_v43 = vld [vmem:[%s1043_s3 + $0x3] ss:$0 sm:$0xff] }
   0x7   :  { %v56_v14 = vunpack.c.0.s8 %v54_v11  ;;  %v55_v15 = vsel %vm26_vm1, 16843009, %v843_v2 }
   0x8   :  { %v57_v21 = vunpack.c.0.s8 %v55_v15 }
   0x9   :  { %vm916_vm2 = vcmp.ne.s32.totalorder %v56_v14, 0 }
   0xa   :  { %339 = vperm.xlu1 %762, %v679_v5   ;;  %334 = vperm.xlu0 %761, %v678_v6   ;;  %vm925_vm6 = vcmp.ne.s32.totalorder %v57_v21, 0 }
   0xe   :  { %491 = vperm.xlu1 %762, %v687_v7   ;;  %486 = vperm.xlu0 %761, %v686_v8  }
  0x81   :  { %v183_v16 = vpop.permute.xlu1 %182  ;;  %v33_v17 = vpop.permute.xlu0 %32 }
  0x82   :  { %v196_v18 = vadd.f32 %v673_v12, %v183_v16  ;;  %v46_v19 = vadd.f32 %v667_v13, %v33_v17 }
  0x84   :  { %v200_v22 = vmul.f32 0.2, %v196_v18  ;;  %v50_v23 = vmul.f32 0.2, %v46_v19  ;;  %vm48_vm3 = vcmp.ge.f32.partialorder %v46_v19, 0.0  ;;  %vm198_vm4 = vcmp.ge.f32.partialorder %v196_v18, 0.0 }
  0x85   :  { %v188_v24 = vpop.permute.xlu1 %187  ;;  %v38_v25 = vpop.permute.xlu0 %37 }
  0x86   :  { %v197_v26 = vadd.f32 %v673_v12, %v188_v24  ;;  %v47_v27 = vadd.f32 %v667_v13, %v38_v25  ;;  %v52_v28 = vsel %vm48_vm3, %v46_v19, %v50_v23  ;;  %v202_v29 = vsel %vm198_vm4, %v196_v18, %v200_v22 }
  0x87   :  { %v60_v31 = vsel %vm916_vm2, %v52_v28, 0.0  ;;  %v204_v33 = vsel %vm916_vm2, %v202_v29, 0.0 }
  0x88   :  { %v201_v34 = vmul.f32 0.2, %v197_v26  ;;  %v51_v35 = vmul.f32 0.2, %v47_v27  ;;  %v63_v36 = vsel %vm62_vm5, %v60_v31, -inf  ;;  %vm49_vm7 = vcmp.ge.f32.partialorder %v47_v27, 0.0 }
  0x89   :  { %v340_v37 = vpop.permute.xlu1 %339  ;;  %v335_v38 = vpop.permute.xlu0 %334  ;;  %64 = vmax.xlane.f32.xlu0 %v63_v36  ;;  %vm199_vm8 = vcmp.ge.f32.partialorder %v197_v26, 0.0  ;;  %v206_v45 = vsel %vm62_vm5, %v204_v33, -inf }
  0x8a   :  { %v349_v39 = vadd.f32 %v681_v30, %v340_v37  ;;  %v348_v40 = vadd.f32 %v681_v30, %v335_v38  ;;  %v53_v41 = vsel %vm49_vm7, %v47_v27, %v51_v35  ;;  %v203_v42 = vsel %vm199_vm8, %v197_v26, %v201_v34 }
  0x8b   :  { %v61_v44 = vsel %vm925_vm6, %v53_v41, 0.0  ;;  %v205_v46 = vsel %vm925_vm6, %v203_v42, 0.0 }
  0x8c   :  { %v353_v47 = vmul.f32 0.2, %v349_v39  ;;  %v352_v48 = vmul.f32 0.2, %v348_v40  ;;  %v66_v49 = vsel %vm62_vm5, %v61_v44, -inf  ;;  %vm350_vm9 = vcmp.ge.f32.partialorder %v348_v40, 0.0 }
  0x8d   :  { %v492_v50 = vpop.permute.xlu1 %491  ;;  %v487_v51 = vpop.permute.xlu0 %486  ;;  %67 = vmax.xlane.f32.xlu1 %v66_v49  ;;  %207 = vmax.xlane.f32.xlu0 %v206_v45  ;;  %vm351_vm10 = vcmp.ge.f32.partialorder %v349_v39, 0.0  ;;  %v209_v57 = vsel %vm62_vm5, %v205_v46, -inf  ;;  %v87_v45 = vld [vmem:[%s1041_s1] sm:$0xff]  ;;  %v675_v49 = vld [vmem:[%s1041_s1 + $0x18] sm:$0xff] }
  0x8e   :  { %v501_v52 = vadd.f32 %v689_v43, %v492_v50  ;;  %v500_v53 = vadd.f32 %v689_v43, %v487_v51  ;;  %v354_v54 = vsel %vm350_vm9, %v348_v40, %v352_v48  ;;  %v355_v55 = vsel %vm351_vm10, %v349_v39, %v353_v47  ;;  %v674_v48 = vld [vmem:[%s1041_s1 + $0x10] sm:$0xff]  ;;  %v682_v51 = vld [vmem:[%s1041_s1 + $0x20] sm:$0xff] }
  0x8f   :  { %v356_v56 = vsel %vm916_vm2, %v354_v54, 0.0  ;;  %v357_v61 = vsel %vm925_vm6, %v355_v55, 0.0  ;;  %v742_v50 = vpack.c.bf16 %v675_v49, %v674_v48  ;;  %v690_v54 = vld [vmem:[%s1041_s1 + $0x30] sm:$0xff]  ;;  %v691_v55 = vld [vmem:[%s1041_s1 + $0x38] sm:$0xff] }
  0x90   :  { %v505_v58 = vmul.f32 0.2, %v501_v52  ;;  %v504_v59 = vmul.f32 0.2, %v500_v53  ;;  %v358_v60 = vsel %vm62_vm5, %v356_v56, -inf  ;;  %vm502_vm11 = vcmp.ge.f32.partialorder %v500_v53, 0.0 }
  0x91   :  { %359 = vmax.xlane.f32.xlu1 %v358_v60  ;;  %210 = vmax.xlane.f32.xlu0 %v209_v57  ;;  %vm503_vm12 = vcmp.ge.f32.partialorder %v501_v52, 0.0  ;;  %v361_v2 = vsel %vm62_vm5, %v357_v61, -inf }
  0x92   :  { %v506_v62 = vsel %vm502_vm11, %v500_v53, %v504_v59  ;;  %v507_v63 = vsel %vm503_vm12, %v501_v52, %v505_v58  ;;  %743 = vmatprep.subr.bf16.mxu1 %v742_v50  ;;  %v683_v52 = vld [vmem:[%s1041_s1 + $0x28] sm:$0xff] }
  0x93   :  { %v508_v0 = vsel %vm916_vm2, %v506_v62, 0.0  ;;  %v509_v3 = vsel %vm925_vm6, %v507_v63, 0.0  ;;  %745 = vmatpush3.bf16.msra.mxu1 %v742_v50  ;;  %v746_v53 = vpack.c.bf16 %v683_v52, %v682_v51 }
  0x94   :  { %v510_v1 = vsel %vm62_vm5, %v508_v0, -inf  ;;  %v513_v4 = vsel %vm62_vm5, %v509_v3, -inf }
  0x95   :  { %511 = vmax.xlane.f32.xlu1 %v510_v1  ;;  %362 = vmax.xlane.f32.xlu0 %v361_v2 }
  0x99   :  { %514 = vmax.xlane.f32.xlu0 %v513_v4 }
 0x116   :  { %v65_v5 = vpop.xlane.xlu0 %64 }
 0x117   :  { %v69_v6 = vsub.f32 %v60_v31, %v65_v5 }
 0x119   :  { %v71_v7 = vmul.f32 1.442695, %v69_v6 }
 0x11a   :  { %v68_v8 = vpop.xlane.xlu1 %67  ;;  %v208_v9 = vpop.xlane.xlu0 %207 }
 0x11b   :  { %763 = vpow2.f32 %v71_v7  ;;  %v70_v10 = vsub.f32 %v61_v44, %v68_v8  ;;  %v212_v11 = vsub.f32 %v204_v33, %v208_v9 }
 0x11d   :  { %v73_v12 = vmul.f32 1.442695, %v70_v10  ;;  %v214_v13 = vmul.f32 1.442695, %v212_v11 }
 0x11e   :  { %v360_v14 = vpop.xlane.xlu1 %359  ;;  %v211_v15 = vpop.xlane.xlu0 %210 }
 0x11f   :  { %765 = vpow2.f32 %v73_v12  ;;  %v364_v16 = vsub.f32 %v356_v56, %v360_v14  ;;  %v213_v17 = vsub.f32 %v205_v46, %v211_v15  ;;  %v88_v46 = vld [vmem:[%s1041_s1 + $0x8] sm:$0xff]  ;;  %v750_v56 = vpack.c.bf16 %v691_v55, %v690_v54  ;;  %s844_s1 = smov [#allocation4]  }
 0x120   :  { %767 = vpow2.f32 %v214_v13  ;;  %v738_v47 = vpack.c.bf16 %v88_v46, %v87_v45  ;;  %s652_s9 = sshll.u32 %s844_s1, 4  ;;  %s653_s9 = int_to_ptr.vmem [resolvable:$true] %s652_s9 }
 0x121   :  { %v366_v18 = vmul.f32 1.442695, %v364_v16  ;;  %v216_v19 = vmul.f32 1.442695, %v213_v17  ;;  %751 = vmatprep.subr.bf16.mxu1 %v750_v56  ;;  %s795_s11 = scalar_lea.vmem %s653_s9, 256  ;;  %p800_p1 = scmp.lt.s32.totalorder %s653_s9, %s653_s9 }
 0x122   :  { %v512_v20 = vpop.xlane.xlu1 %511  ;;  %v363_v21 = vpop.xlane.xlu0 %362  ;;  %739 = vmatprep.subr.bf16.mxu0 %v738_v47  ;;  %p796_p0 = scmp.ne.s32.totalorder %s653_s9, %s795_s11  ;;  %p801_p2 = scmp.lt.s32.totalorder %s795_s11, %s795_s11 }
 0x123   :  { %769 = vpow2.f32 %v366_v18  ;;  %v516_v22 = vsub.f32 %v508_v0, %v512_v20  ;;  %v365_v23 = vsub.f32 %v357_v61, %v363_v21  ;;  %741 = vmatpush3.bf16.msra.mxu0 %v738_v47 }
 0x124   :  { %771 = vpow2.f32 %v216_v19  ;;  %747 = vmatprep.subr.bf16.mxu0 %v746_v53  ;;  %p802_p3 = por %p801_p2, %p800_p1 }
 0x125   :  { %v764_v24 = vpop.eup %763  ;;  %v518_v25 = vmul.f32 1.442695, %v516_v22  ;;  %v368_v26 = vmul.f32 1.442695, %v365_v23 }
 0x126   :  { %v515_v27 = vpop.xlane.xlu0 %514  ;;  %v75_v28 = vsel %vm62_vm5, %v764_v24, 0.0  ;;  %p803_p4 = pnand %p802_p3, %p796_p0 }
 0x127   :  { %773 = vpow2.f32 %v518_v25  ;;  %v517_v29 = vsub.f32 %v509_v3, %v515_v27  ;;  %76 = vadd.xlane.f32.xlu1 %v75_v28 }
 0x128   :  { %775 = vpow2.f32 %v368_v26 }
 0x129   :  { %v766_v30 = vpop.eup %765  ;;  %v520_v31 = vmul.f32 1.442695, %v517_v29 }
 0x12a   :  { %v768_v32 = vpop.eup %767  ;;  %v78_v33 = vsel %vm62_vm5, %v766_v30, 0.0 }
 0x12b   :  { %777 = vpow2.f32 %v520_v31  ;;  %79 = vadd.xlane.f32.xlu0 %v78_v33  ;;  %v218_v34 = vsel %vm62_vm5, %v768_v32, 0.0 }
 0x12c   :  { %219 = vadd.xlane.f32.xlu1 %v218_v34 }
 0x12d   :  { %v770_v35 = vpop.eup %769 }
 0x12e   :  { %v772_v36 = vpop.eup %771  ;;  %v370_v37 = vsel %vm62_vm5, %v770_v35, 0.0 }
 0x12f   :  { %v221_v38 = vsel %vm62_vm5, %v772_v36, 0.0 }
 0x130   :  { %371 = vadd.xlane.f32.xlu1 %v370_v37  ;;  %222 = vadd.xlane.f32.xlu0 %v221_v38 }
 0x131   :  { %v959_v39 = vpop.eup %773 }
 0x132   :  { %v961_v40 = vpop.eup %775  ;;  %v522_v41 = vsel %vm62_vm5, %v959_v39, 0.0 }
 0x133   :  { %v373_v42 = vsel %vm62_vm5, %v961_v40, 0.0 }
 0x134   :  { %523 = vadd.xlane.f32.xlu1 %v522_v41  ;;  %374 = vadd.xlane.f32.xlu0 %v373_v42 }
 0x135   :  { %v967_v43 = vpop.eup %777 }
 0x136   :  { %v525_v44 = vsel %vm62_vm5, %v967_v43, 0.0 }
 0x138   :  { %526 = vadd.xlane.f32.xlu0 %v525_v44 }
 0x1b4   :  { %v77_v57 = vpop.xlane.xlu1 %76 }
 0x1b5   :  { %779 = vrcp.f32 %v77_v57 }
 0x1b8   :  { %v80_v58 = vpop.xlane.xlu0 %79 }
 0x1b9   :  { %v220_v59 = vpop.xlane.xlu1 %219  ;;  %781 = vrcp.f32 %v80_v58 }
 0x1ba   :  { %783 = vrcp.f32 %v220_v59 }
 0x1bd   :  { %v372_v60 = vpop.xlane.xlu1 %371  ;;  %v223_v61 = vpop.xlane.xlu0 %222 }
 0x1be   :  { %785 = vrcp.f32 %v372_v60 }
 0x1bf   :  { %v780_v62 = vpop.eup %779  ;;  %787 = vrcp.f32 %v223_v61 }
 0x1c0   :  { %v83_v63 = vmul.f32 %v780_v62, %v764_v24 }
 0x1c1   :  { %v524_v0 = vpop.xlane.xlu1 %523  ;;  %v375_v1 = vpop.xlane.xlu0 %374 }
 0x1c2   :  { %789 = vrcp.f32 %v524_v0  ;;  %714 = vmatprep.mubr.msk.f32.mxu0 %vm62_vm5, %v83_v63 }
 0x1c3   :  { %v782_v2 = vpop.eup %781  ;;  %791 = vrcp.f32 %v375_v1 }
 0x1c4   :  { %v784_v3 = vpop.eup %783  ;;  %v84_v4 = vmul.f32 %v782_v2, %v766_v30 }
 0x1c5   :  { %v527_v5 = vpop.xlane.xlu0 %526  ;;  %v226_v6 = vmul.f32 %v784_v3, %v768_v32 }
 0x1c6   :  { %793 = vrcp.f32 %v527_v5  ;;  %715 = vmatmul.mubr.msk.f32.vlgmr.msra.gmra.mrb[0].mxu0 %vm62_vm5, %v84_v4 }
 0x1c7   :  { %721 = vmatprep.mubr.msk.f32.mxu1 %vm62_vm5, %v226_v6  ;;  %749 = vmatpush3.bf16.msra.mxu0 %v746_v53  ;;  %v228_v11 = vadd.f32 %v226_v6, %v83_v63 }
 0x1c8   :  { %v786_v7 = vpop.eup %785 }
 0x1c9   :  { %v788_v8 = vpop.eup %787  ;;  %v378_v9 = vmul.f32 %v786_v7, %v770_v35 }
 0x1ca   :  { %v227_v10 = vmul.f32 %v788_v8, %v772_v36 }
 0x1cb   :  { %728 = vmatprep.mubr.msk.f32.mxu0 %vm62_vm5, %v378_v9  ;;  %v380_v14 = vadd.f32 %v378_v9, %v228_v11 }
 0x1cc   :  { %v790_v12 = vpop.eup %789  ;;  %722 = vmatmul.mubr.msk.f32.vlgmr.msra.gmra.mrb[0].mxu1 %vm62_vm5, %v227_v10  ;;  %v229_v18 = vadd.f32 %v227_v10, %v84_v4 }
 0x1cd   :  { %v792_v13 = vpop.eup %791  ;;  %v530_v15 = vmul.f32 %v790_v12, %v959_v39  ;;  %753 = vmatpush3.bf16.msra.mxu1 %v750_v56 }
 0x1ce   :  { %v379_v16 = vmul.f32 %v792_v13, %v961_v40 }
 0x1cf   :  { %v532_v17 = vadd.f32 %v530_v15, %v380_v14  ;;  %735 = vmatprep.mubr.msk.f32.mxu1 %vm62_vm5, %v530_v15 }
 0x1d0   :  { %v794_v19 = vpop.eup %793  ;;  %729 = vmatmul.mubr.msk.f32.vlgmr.msra.gmra.mrb[2].mxu0 %vm62_vm5, %v379_v16  ;;  %v381_v22 = vadd.f32 %v379_v16, %v229_v18 }
 0x1d1   :  { %v531_v20 = vmul.f32 %v794_v19, %v967_v43  ;;  %v631_v21 = vmul.f32 0.25, %v532_v17 }
 0x1d3   :  { %633 = vst.msk [vmem:[#allocation4] sm:$0xff] %vm62_vm5, %v631_v21  ;;  %736 = vmatmul.mubr.msk.f32.vlgmr.msra.gmra.mrb[2].mxu1 %vm62_vm5, %v531_v20  ;;  %v533_v23 = vadd.f32 %v531_v20, %v381_v22 }
 0x1d5   :  { %v632_v24 = vmul.f32 0.25, %v533_v23 }
 0x1d7   :  { %634 = vst.msk [vmem:[#allocation4 + $0x8] sm:$0xff] %vm62_vm5, %v632_v24 }
 0x299   :  { %v716_v25 = vpop.f32.mrb[0].mxu0 }
 0x29a   :  { %v171_v26 = vmax.f32 %v716_v25, 0.0  ;;  %v161_v27 = vpop.f32.mrb[1].mxu0 }
 0x29b   :  { %v170_v28 = vmax.f32 %v161_v27, 0.0 }
 0x29c   :  { %174 = vst.msk [vmem:[#allocation2 + $0x8] sm:$0xff] %vm172_vm13, %v171_v26 }
 0x29d   :  { %173 = vst.msk [vmem:[#allocation2] sm:$0xff] %vm172_vm13, %v170_v28 }
 0x29f   :  { %v723_v29 = vpop.f32.mrb[0].mxu1 }
 0x2a0   :  { %v315_v30 = vmax.f32 %v723_v29, 0.0  ;;  %v305_v31 = vpop.f32.mrb[1].mxu1 }
 0x2a1   :  { %v314_v32 = vmax.f32 %v305_v31, 0.0 }
 0x2a2   :  { %320 = vrot.lane.b32.xlu0 %v315_v30, %s845_s10 }
 0x2a3   :  { %318 = vrot.lane.b32.xlu1 %v314_v32, %s845_s10  ;;  %v730_v33 = vpop.f32.mrb[2].mxu0 }
 0x2a4   :  { %v467_v34 = vmax.f32 %v730_v33, 0.0  ;;  %v457_v35 = vpop.f32.mrb[3].mxu0 }
 0x2a5   :  { %806 = shalt.err (!%p803_p4)
}
 0x2a6   :  { %s807_s14 = scalar_lea.hbm %s1045_s5, 256 }
 0x2a7   :  { %p808_p5 = scmp.ne.s32.totalorder %s1045_s5, %s807_s14  ;;  %p811_p6 = scmp.lt.u32.totalorder %s807_s14, %s1045_s5 }
 0x2a9   :  { %p813_p7 = pnand %p811_p6, %p808_p5 }
 0x2ab   :  { %816 = shalt.err (!%p813_p7)
}
 0x2ac   :  { %s846_s17 = smov 128   ;;  %v737_v36 = vpop.f32.mrb[2].mxu1  ;;  %s847_s19 = smov 16   ;;  %v466_v39 = vmax.f32 %v457_v35, 0.0  ;;  %vm324_vm14 = vcmask 130112   ;;  %vm476_vm15 = vcmask 195712  }
 0x2ad   :  { %658 = dma.vmem_to_hbm [thread:$0]  %s653_s9, 256, %s1045_s5, [#allocation5], %s846_s17, %s846_s17, %s845_s10   ;;  %v609_v37 = vpop.f32.mrb[3].mxu1  ;;  %v619_v40 = vmax.f32 %v737_v36, 0.0  ;;  %vm628_vm0 = vcmask 261312  }
 0x2ae   :  { %472 = vrot.lane.b32.xlu1 %v467_v34, %s847_s19  ;;  %v618_v38 = vmax.f32 %v609_v37, 0.0  ;;  %s848_s20 = smov 24   ;;  %s849_s5 = smov [#allocation2]  }
 0x2af   :  { %s640_s21 = sshll.u32 %s849_s5, 4  ;;  %s641_s21 = int_to_ptr.vmem [resolvable:$true] %s640_s21 }
 0x2b0   :  { %622 = vrot.lane.b32.xlu0 %v618_v38, %s848_s20  ;;  %s817_s22 = scalar_lea.vmem %s641_s21, 256  ;;  %p822_p9 = scmp.lt.s32.totalorder %s641_s21, %s641_s21 }
 0x2b1   :  { %p818_p8 = scmp.ne.s32.totalorder %s641_s21, %s817_s22  ;;  %p823_p10 = scmp.lt.s32.totalorder %s817_s22, %s817_s22 }
 0x2b2   :  { %470 = vrot.lane.b32.xlu1 %v466_v39, %s847_s19 }
 0x2b3   :  { %p824_p11 = por %p823_p10, %p822_p9 }
 0x2b5   :  { %p825_p12 = pnand %p824_p11, %p818_p8 }
 0x2b6   :  { %624 = vrot.lane.b32.xlu1 %v619_v40, %s848_s20 }
 0x314   :  { %v321_v41 = vpop.permute.xlu0 %320 }
 0x315   :  { %326 = vst.msk [vmem:[#allocation2 + $0x8] sm:$0xff] %vm324_vm14, %v321_v41  ;;  %v319_v42 = vpop.permute.xlu1 %318 }
 0x316   :  { %325 = vst.msk [vmem:[#allocation2] sm:$0xff] %vm324_vm14, %v319_v42 }
 0x320   :  { %v473_v43 = vpop.permute.xlu1 %472 }
 0x321   :  { %478 = vst.msk [vmem:[#allocation2 + $0x8] sm:$0xff] %vm476_vm15, %v473_v43 }
 0x322   :  { %v623_v44 = vpop.permute.xlu0 %622 }
 0x324   :  { %v471_v45 = vpop.permute.xlu1 %470 }
 0x325   :  { %477 = vst.msk [vmem:[#allocation2] sm:$0xff] %vm476_vm15, %v471_v45 }
 0x326   :  { %629 = vst.msk [vmem:[#allocation2] sm:$0xff] %vm628_vm0, %v623_v44 }
 0x328   :  { %v625_v46 = vpop.permute.xlu1 %624 }
 0x329   :  { %630 = vst.msk [vmem:[#allocation2 + $0x8] sm:$0xff] %vm628_vm0, %v625_v46 }
 0x32a   :  { %828 = shalt.err (!%p825_p12)
}
 0x32b   :  { %s829_s25 = scalar_lea.hbm %s1044_s4, 256 }
 0x32c   :  { %p830_p13 = scmp.ne.s32.totalorder %s1044_s4, %s829_s25  ;;  %p833_p0 = scmp.lt.u32.totalorder %s829_s25, %s1044_s4 }
 0x32e   :  { %p835_p1 = pnand %p833_p0, %p830_p13 }
 0x330   :  { %838 = shalt.err (!%p835_p1)
}
 0x331   :  { %646 = dma.vmem_to_hbm [thread:$0]  %s641_s21, 256, %s1044_s4, [#allocation3], %s846_s17, %s846_s17, %s845_s10  }
 0x332   :  { %839 = dma.done.wait [#allocation3], 256  }
 0x333   :  { %840 = vsyncadd [#allocation3], 4294967040 }
 0x334   :  { %841 = dma.done.wait [#allocation5], 256  }
 0x335   :  { %842 = vsyncadd [#allocation5], 4294967040 }
 0x336   :  { %665 = vsyncpa [#allocation3], 1 }
 0x337   :  { %666 = vsyncpa [#allocation5], 1 }

</bundles_post_ra>
